<compile_context>
chip_gen: v7x
topology: tpu7x:2x2x1
jax: 0.10.0
libtpu: 0.0.40
codegen_flags: <defaults>
</compile_context>

<pallas_src>
import functools

import jax
import jax.numpy as jnp
import numpy as np
from jax import lax
from jax.experimental import pallas as pl
from jax.experimental.pallas import tpu as pltpu


def _round_up(x, m):
    return (x + m - 1) // m * m


def _pick_time_chunk(T, cap=32):
    """Time-chunk size; caller pads T up to a multiple of it."""
    if T <= cap:
        return T
    best_tc, best_pad = cap, cap
    for tc in range(cap, 7, -1):
        pad = (-T) % tc
        if pad == 0:
            return tc
        if pad < best_pad:
            best_tc, best_pad = tc, pad
    return best_tc


def _use_bf16_nonlin():
    """bf16 EUP (sigmoid/tanh) is ~2x on v6e/v7x; v5e has no bf16 EUP/VPU."""
    try:
        kind = jax.devices()[0].device_kind.lower()
    except Exception:
        return False
    return any(tag in kind for tag in ("v6", "v7", "7x"))


# ----------------------------- Pallas kernel ------------------------------ #
def _lstm_layer_kernel(x_ref, w_ih_hbm, w_hh_hbm, b_ref,          # inputs
                       out_ref, h_ref, c_ref,                      # outputs
                       w_ih_vmem, w_hh_vmem, xproj_ref, dma_sems,  # scratch
                       *, Hl, G, Tc, T_real, Tp, act_dtype):
    """One LSTM layer over a chunk of Tc timesteps.

    Grid axis 0 = time-chunk index (sequential, 'arbitrary').

    x_ref    : (Tc, Bp, Hl) bf16  input time-chunk (time-major)
    w_ih_hbm : (Hl, G) bf16 HBM   input weights  (fused gate cols [i,f,o,g])
    w_hh_hbm : (Hl, G) bf16 HBM   recurrent weights
    b_ref    : (1, G)  f32        b_ih + b_hh
    out_ref  : (Tc, Bp, Hl)       per-step hidden outputs (f32 or bf16)
    h_ref    : (Bp, Hl) f32       hidden state (VMEM-resident accumulator)
    c_ref    : (Bp, Hl) f32       cell state   (VMEM-resident accumulator)
    """
    t = pl.program_id(0)

    @pl.when(t == 0)
    def _init():
        # Single-buffer the constant weights: one DMA into persistent VMEM
        # scratch (avoids the BlockSpec pipeline double-buffering 2x the
        # weight footprint -- a real VMEM problem at production H on v7x).
        cp_i = pltpu.make_async_copy(w_ih_hbm, w_ih_vmem, dma_sems.at[0])
        cp_h = pltpu.make_async_copy(w_hh_hbm, w_hh_vmem, dma_sems.at[1])
        cp_i.start()
        cp_h.start()
        cp_i.wait()
        cp_h.wait()
        h_ref[...] = jnp.zeros_like(h_ref)
        c_ref[...] = jnp.zeros_like(c_ref)

    # Invariant loads hoisted out of the loops.
    w_i = w_ih_vmem[...]            # (Hl, G) bf16
    w_h = w_hh_vmem[...]            # (Hl, G) bf16
    b = b_ref[...]                  # (1, G)  f32

    # --- Phase 1: input projection for the whole chunk (off the serial path).
    def proj_body(j, carry):
        x_t = x_ref[j]              # (Bp, Hl) bf16
        xproj_ref[j] = jnp.dot(x_t, w_i,
                               preferred_element_type=jnp.float32) + b
        return carry

    lax.fori_loop(0, Tc, proj_body, 0, unroll=True)

    # --- Phase 2: recurrence; only h @ W_hh stays on the per-step chain.
    def step(i, carry):
        h, c = carry                # (Bp, Hl) f32, carried in vregs
        gates = xproj_ref[i] + jnp.dot(h.astype(jnp.bfloat16), w_h,
                                       preferred_element_type=jnp.float32)
        gin = gates.astype(act_dtype)
        if Hl % 128 == 0:
            # 128-aligned per-gate columns: sigmoid only over [i, f, o].
            sig = jax.nn.sigmoid(gin[:, :3 * Hl])
            i_g = sig[:, :Hl]
            f_g = sig[:, Hl:2 * Hl]
            o_g = sig[:, 2 * Hl:3 * Hl]
            g_g = jnp.tanh(gin[:, 3 * Hl:])
        else:
            # Packed small-H gates: full-width nonlinearities (vreg
            # granularity) + gate extraction via lane rolls (XLU slot) and
            # offset-0 slices (no unaligned lane slicing).
            sig = jax.nn.sigmoid(gin)
            i_g = sig[:, :Hl]
            f_g = pltpu.roll(sig, G - Hl, axis=1)[:, :Hl]
            o_g = pltpu.roll(sig, G - 2 * Hl, axis=1)[:, :Hl]
            g_g = jnp.tanh(pltpu.roll(gin, G - 3 * Hl, axis=1)[:, :Hl])
        f32 = jnp.float32
        c_new = f_g.astype(f32) * c + i_g.astype(f32) * g_g.astype(f32)
        h_new = o_g.astype(f32) * jnp.tanh(c_new)
        if Tp != T_real:
            # Padded timesteps (zero inputs) must not advance the state.
            keep = (t * Tc + i) < T_real
            c_new = jnp.where(keep, c_new, c)
            h_new = jnp.where(keep, h_new, h)
        out_ref[i] = h_new.astype(out_ref.dtype)   # single per-step store
        return h_new, c_new

    unroll = 8 if (Tc > 16 and Tc % 8 == 0) else True
    h_fin, c_fin = lax.fori_loop(0, Tc, step, (h_ref[...], c_ref[...]),
                                 unroll=unroll)
    h_ref[...] = h_fin
    c_ref[...] = c_fin


def _lstm_layer(x_tbh, w_ih, w_hh, b_row, *, Tc, T_real, out_dtype, act_dtype):
    """Run one LSTM layer over a padded time-major (Tp, Bp, Hl) sequence."""
    Tp, Bp, Hl = x_tbh.shape
    G = w_ih.shape[1]
    grid = (Tp // Tc,)
    kernel = functools.partial(_lstm_layer_kernel, Hl=Hl, G=G, Tc=Tc,
                               T_real=T_real, Tp=Tp, act_dtype=act_dtype)
    out, h_n, c_n = pl.pallas_call(
        kernel,
        out_shape=(jax.ShapeDtypeStruct((Tp, Bp, Hl), out_dtype),
                   jax.ShapeDtypeStruct((Bp, Hl), jnp.float32),
                   jax.ShapeDtypeStruct((Bp, Hl), jnp.float32)),
        grid_spec=pltpu.PrefetchScalarGridSpec(
            num_scalar_prefetch=0,
            grid=grid,
            in_specs=[
                pl.BlockSpec((Tc, Bp, Hl), lambda t: (t, 0, 0)),   # x chunk
                pl.BlockSpec(memory_space=pl.ANY),                 # W_ih (HBM)
                pl.BlockSpec(memory_space=pl.ANY),                 # W_hh (HBM)
                pl.BlockSpec((1, G), lambda t: (0, 0)),            # bias
            ],
            out_specs=[
                pl.BlockSpec((Tc, Bp, Hl), lambda t: (t, 0, 0)),   # out chunk
                pl.BlockSpec((Bp, Hl), lambda t: (0, 0)),          # h_n (resident)
                pl.BlockSpec((Bp, Hl), lambda t: (0, 0)),          # c_n (resident)
            ],
            scratch_shapes=[
                pltpu.VMEM((Hl, G), jnp.bfloat16),     # W_ih, single-buffered
                pltpu.VMEM((Hl, G), jnp.bfloat16),     # W_hh, single-buffered
                pltpu.VMEM((Tc, Bp, G), jnp.float32),  # chunk input projection
                pltpu.SemaphoreType.DMA((2,)),
            ]),
        compiler_params=pltpu.CompilerParams(
            dimension_semantics=("arbitrary",)),       # recurrent -> sequential
    )(x_tbh, w_ih, w_hh, b_row)
    return out, h_n, c_n


# -------------------------- parameter preparation -------------------------- #
def _prep_layer_params(w_ih, w_hh, b_ih, b_hh, H, Hl, G):
    """Fuse + repack one layer's PyTorch LSTM params.

    Gate column order is [i, f, o, g] (sigmoid block contiguous), stride Hl per
    gate (Hl == H for small H -> packed; Hl == round_up(H,128) otherwise).
    Padded rows / columns are zero so padded lanes stay harmless.
    """
    w_ih = jnp.asarray(w_ih, jnp.float32)          # (4H, in)  torch order [i,f,g,o]
    w_hh = jnp.asarray(w_hh, jnp.float32)          # (4H, H)
    in_size = w_ih.shape[1]
    b_sum = jnp.asarray(b_ih, jnp.float32) + jnp.asarray(b_hh, jnp.float32)

    wi = jnp.zeros((Hl, G), jnp.float32)
    wh = jnp.zeros((Hl, G), jnp.float32)
    b = jnp.zeros((1, G), jnp.float32)
    for slot, tg in enumerate((0, 1, 3, 2)):       # ours [i,f,o,g] <- torch [i,f,g,o]
        cols = slice(slot * Hl, slot * Hl + H)
        wi = wi.at[:in_size, cols].set(w_ih[tg * H:(tg + 1) * H, :].T)
        wh = wh.at[:H, cols].set(w_hh[tg * H:(tg + 1) * H, :].T)
        b = b.at[0, cols].set(b_sum[tg * H:(tg + 1) * H])
    return wi.astype(jnp.bfloat16), wh.astype(jnp.bfloat16), b


# ----------------------------- Encoder wrapper ----------------------------- #
def encoder_forward(token_ids, embedding_matrix, lstm_params):
    """Mirrors Encoder.forward (eval mode).

    token_ids        : int32 (B, T)
    embedding_matrix : f32 (vocab, H)   (frozen)
    lstm_params      : list of (w_ih, w_hh, b_ih, b_hh) per layer,
                       PyTorch shapes: (4H, in), (4H, H), (4H,), (4H,)
    Returns (output (B,T,H), (h_n (L,B,H), c_n (L,B,H)))
    """
    emb = jnp.asarray(embedding_matrix, jnp.float32)
    B, T = token_ids.shape
    H = emb.shape[1]
    Bp = _round_up(B, 8)                               # sublane multiple
    Hl = H if H < 128 else _round_up(H, 128)           # per-gate stride / lane width
    G = _round_up(4 * Hl, 128)                         # fused gate width
    Tc = _pick_time_chunk(T)
    Tp = _round_up(T, Tc)
    act_dtype = jnp.bfloat16 if _use_bf16_nonlin() else jnp.float32

    # Embedding gather directly in time-major order; activations carried in
    # bf16 (the MXU consumes bf16 anyway) to halve inter-layer HBM traffic.
    # TODO(synk): the gather + pad could be fused into layer 0's pallas_call via
    # scalar-prefetched token ids / manual DMA gather; kept in XLA here.
    x = jnp.take(emb, token_ids.T, axis=0).astype(jnp.bfloat16)    # (T, B, H)
    x = jnp.pad(x, ((0, Tp - T), (0, Bp - B), (0, Hl - H)))

    num_layers = len(lstm_params)
    h_list, c_list = [], []
    for li, (w_ih, w_hh, b_ih, b_hh) in enumerate(lstm_params):
        wi, wh, b_row = _prep_layer_params(w_ih, w_hh, b_ih, b_hh, H, Hl, G)
        out_dtype = jnp.float32 if li == num_layers - 1 else jnp.bfloat16
        x, h_n, c_n = _lstm_layer(x, wi, wh, b_row, Tc=Tc, T_real=T,
                                  out_dtype=out_dtype, act_dtype=act_dtype)
        h_list.append(h_n[:B, :H])
        c_list.append(c_n[:B, :H])
        # TODO(synk): inter-layer dropout only applies in training mode; this
        # kernel implements eval/inference semantics (dropout = identity).

    # TODO(synk): the batch-first layout of the last layer could be produced
    # in-kernel (chunk-end transposed store); kept as one XLA transpose here.
    output = jnp.transpose(x[:T, :B, :H], (1, 0, 2))
    return output, (jnp.stack(h_list, 0), jnp.stack(c_list, 0))


# ----------------------------- pure-JAX reference -------------------------- #
def _reference_forward(token_ids, embedding_matrix, lstm_params):
    x = jnp.take(embedding_matrix, token_ids, axis=0)    # (B, T, H)
    B, T, H = x.shape
    h_list, c_list = [], []
    for (w_ih, w_hh, b_ih, b_hh) in lstm_params:
        h = jnp.zeros((B, H), jnp.float32)
        c = jnp.zeros((B, H), jnp.float32)
        outs = []
        for t in range(T):
            gates = x[:, t, :] @ w_ih.T + b_ih + h @ w_hh.T + b_hh
            i = jax.nn.sigmoid(gates[:, 0 * H:1 * H])
            f = jax.nn.sigmoid(gates[:, 1 * H:2 * H])
            g = jnp.tanh(gates[:, 2 * H:3 * H])
            o = jax.nn.sigmoid(gates[:, 3 * H:4 * H])
            c = f * c + i * g
            h = o * jnp.tanh(c)
            outs.append(h)
        x = jnp.stack(outs, axis=1)
        h_list.append(h)
        c_list.append(c)
    return x, (jnp.stack(h_list, 0), jnp.stack(c_list, 0))


# ---------------------------------- main ----------------------------------- #
if __name__ == "__main__":
    B, T, H = 2, 8, 32          # batch, seq len, hidden (= embedding dim)
    VOCAB = 20
    NUM_LAYERS = 2

    key = jax.random.PRNGKey(0)
    k_emb, k_tok, *k_layers = jax.random.split(key, 2 + 4 * NUM_LAYERS)

    embedding_matrix = jax.random.normal(k_emb, (VOCAB, H), jnp.float32)
    token_ids = jax.random.randint(k_tok, (B, T), 0, VOCAB, jnp.int32)

    # PyTorch LSTM param init: U(-1/sqrt(H), 1/sqrt(H)); deterministic here.
    bound = 1.0 / np.sqrt(H)
    lstm_params = []
    for layer in range(NUM_LAYERS):
        ks = k_layers[4 * layer: 4 * layer + 4]
        in_size = H  # input_size == hidden_size for every layer in this module
        w_ih = jax.random.uniform(ks[0], (4 * H, in_size), jnp.float32, -bound, bound)
        w_hh = jax.random.uniform(ks[1], (4 * H, H), jnp.float32, -bound, bound)
        b_ih = jax.random.uniform(ks[2], (4 * H,), jnp.float32, -bound, bound)
        b_hh = jax.random.uniform(ks[3], (4 * H,), jnp.float32, -bound, bound)
        lstm_params.append((w_ih, w_hh, b_ih, b_hh))

    out, (h_n, c_n) = encoder_forward(token_ids, embedding_matrix, lstm_params)
    jax.block_until_ready((out, h_n, c_n))

    ref_out, (ref_h, ref_c) = _reference_forward(token_ids, embedding_matrix, lstm_params)
    # Tolerances loosened vs the f32 reference: matmul inputs (and, on v6e/v7x,
    # the gate nonlinearities) are bf16; the c/h carry stays f32.
    np.testing.assert_allclose(np.asarray(out), np.asarray(ref_out), rtol=3e-2, atol=3e-2)
    np.testing.assert_allclose(np.asarray(h_n), np.asarray(ref_h), rtol=3e-2, atol=3e-2)
    np.testing.assert_allclose(np.asarray(c_n), np.asarray(ref_c), rtol=3e-2, atol=3e-2)

    assert out.shape == (B, T, H) and h_n.shape == (NUM_LAYERS, B, H) and c_n.shape == (NUM_LAYERS, B, H)
    print("KERNEL_OK")
</pallas_src>

<mosaic_0001>
module attributes {stable_mosaic.version = 11 : i64} {
  func.func @_lstm_layer_kernel(%arg0: i32, %arg1: memref<8x8x32xbf16, #tpu.memory_space<vmem>>, %arg2: memref<32x128xbf16, #tpu.memory_space<any>>, %arg3: memref<32x128xbf16, #tpu.memory_space<any>>, %arg4: memref<1x128xf32, #tpu.memory_space<vmem>>, %arg5: memref<8x8x32xbf16, #tpu.memory_space<vmem>>, %arg6: memref<8x32xf32, #tpu.memory_space<vmem>>, %arg7: memref<8x32xf32, #tpu.memory_space<vmem>>, %arg8: memref<32x128xbf16, #tpu.memory_space<vmem>>, %arg9: memref<32x128xbf16, #tpu.memory_space<vmem>>, %arg10: memref<8x8x128xf32, #tpu.memory_space<vmem>>, %arg11: memref<2x!tpu.dma_semaphore, #tpu.memory_space<semaphore_mem>>) attributes {dimension_semantics = [#tpu.dimension_semantics<arbitrary>], iteration_bounds = array<i64: 1>, scalar_prefetch = 0 : i64, scratch_operands = 4 : i64, tpu.core_type = #tpu.core_type<tc>, window_params = [{transform_indices = @transform_0, window_bounds = array<i64: 8, 8, 32>}, {}, {}, {pipeline_mode = #tpu.pipeline_mode<synchronous>, transform_indices = @transform_3, window_bounds = array<i64: 1, 128>}, {transform_indices = @transform_4, window_bounds = array<i64: 8, 8, 32>}, {pipeline_mode = #tpu.pipeline_mode<synchronous>, transform_indices = @transform_5, window_bounds = array<i64: 8, 32>}, {pipeline_mode = #tpu.pipeline_mode<synchronous>, transform_indices = @transform_6, window_bounds = array<i64: 8, 32>}]} {
    %c0_i32 = arith.constant 0 : i32
    %0 = arith.cmpi eq, %arg0, %c0_i32 : i32
    %1 = arith.extui %0 : i1 to i32
    %c0_i32_0 = arith.constant 0 : i32
    %2 = arith.cmpi ne, %1, %c0_i32_0 : i32
    scf.if %2 {
      %c0_i32_132 = arith.constant 0 : i32
      %322 = tpu.memref_slice %arg11[%c0_i32_132] : memref<2x!tpu.dma_semaphore, #tpu.memory_space<semaphore_mem>> -> memref<1x!tpu.dma_semaphore, #tpu.memory_space<semaphore_mem>>
      %323 = tpu.memref_squeeze %322 : memref<1x!tpu.dma_semaphore, #tpu.memory_space<semaphore_mem>> -> memref<!tpu.dma_semaphore, #tpu.memory_space<semaphore_mem>>
      tpu.enqueue_dma source(%arg2 : memref<32x128xbf16, #tpu.memory_space<any>>) target(%arg8 : memref<32x128xbf16, #tpu.memory_space<vmem>>) target_semaphore(%323 : memref<!tpu.dma_semaphore, #tpu.memory_space<semaphore_mem>>)
      %c1_i32_133 = arith.constant 1 : i32
      %324 = tpu.memref_slice %arg11[%c1_i32_133] : memref<2x!tpu.dma_semaphore, #tpu.memory_space<semaphore_mem>> -> memref<1x!tpu.dma_semaphore, #tpu.memory_space<semaphore_mem>>
      %325 = tpu.memref_squeeze %324 : memref<1x!tpu.dma_semaphore, #tpu.memory_space<semaphore_mem>> -> memref<!tpu.dma_semaphore, #tpu.memory_space<semaphore_mem>>
      tpu.enqueue_dma source(%arg3 : memref<32x128xbf16, #tpu.memory_space<any>>) target(%arg9 : memref<32x128xbf16, #tpu.memory_space<vmem>>) target_semaphore(%325 : memref<!tpu.dma_semaphore, #tpu.memory_space<semaphore_mem>>)
      %c0_i32_134 = arith.constant 0 : i32
      %326 = tpu.memref_slice %arg11[%c0_i32_134] : memref<2x!tpu.dma_semaphore, #tpu.memory_space<semaphore_mem>> -> memref<1x!tpu.dma_semaphore, #tpu.memory_space<semaphore_mem>>
      %327 = tpu.memref_squeeze %326 : memref<1x!tpu.dma_semaphore, #tpu.memory_space<semaphore_mem>> -> memref<!tpu.dma_semaphore, #tpu.memory_space<semaphore_mem>>
      tpu.wait_dma2 semaphore(%327 : memref<!tpu.dma_semaphore, #tpu.memory_space<semaphore_mem>>) src(%arg2 : memref<32x128xbf16, #tpu.memory_space<any>>) dst(%arg8 : memref<32x128xbf16, #tpu.memory_space<vmem>>)
      %c1_i32_135 = arith.constant 1 : i32
      %328 = tpu.memref_slice %arg11[%c1_i32_135] : memref<2x!tpu.dma_semaphore, #tpu.memory_space<semaphore_mem>> -> memref<1x!tpu.dma_semaphore, #tpu.memory_space<semaphore_mem>>
      %329 = tpu.memref_squeeze %328 : memref<1x!tpu.dma_semaphore, #tpu.memory_space<semaphore_mem>> -> memref<!tpu.dma_semaphore, #tpu.memory_space<semaphore_mem>>
      tpu.wait_dma2 semaphore(%329 : memref<!tpu.dma_semaphore, #tpu.memory_space<semaphore_mem>>) src(%arg3 : memref<32x128xbf16, #tpu.memory_space<any>>) dst(%arg9 : memref<32x128xbf16, #tpu.memory_space<vmem>>)
      %cst_136 = arith.constant 0.000000e+00 : f32
      %330 = vector.broadcast %cst_136 : f32 to vector<8x32xf32>
      %c0_137 = arith.constant 0 : index
      %c0_138 = arith.constant 0 : index
      %331 = vector.load %arg6[%c0_137, %c0_138] : memref<8x32xf32, #tpu.memory_space<vmem>>, vector<8x32xf32>
      tpu.vector_store %arg6[%c0_137, %c0_138], %330 {strides = array<i32>} : memref<8x32xf32, #tpu.memory_space<vmem>>, vector<8x32xf32>,
      %cst_139 = arith.constant 0.000000e+00 : f32
      %332 = vector.broadcast %cst_139 : f32 to vector<8x32xf32>
      %c0_140 = arith.constant 0 : index
      %c0_141 = arith.constant 0 : index
      %333 = vector.load %arg7[%c0_140, %c0_141] : memref<8x32xf32, #tpu.memory_space<vmem>>, vector<8x32xf32>
      tpu.vector_store %arg7[%c0_140, %c0_141], %332 {strides = array<i32>} : memref<8x32xf32, #tpu.memory_space<vmem>>, vector<8x32xf32>,
    } else {
    }
    %c0 = arith.constant 0 : index
    %c0_1 = arith.constant 0 : index
    %3 = vector.load %arg8[%c0, %c0_1] : memref<32x128xbf16, #tpu.memory_space<vmem>>, vector<32x128xbf16>
    %c0_2 = arith.constant 0 : index
    %c0_3 = arith.constant 0 : index
    %4 = vector.load %arg9[%c0_2, %c0_3] : memref<32x128xbf16, #tpu.memory_space<vmem>>, vector<32x128xbf16>
    %c0_4 = arith.constant 0 : index
    %c0_5 = arith.constant 0 : index
    %5 = vector.load %arg4[%c0_4, %c0_5] : memref<1x128xf32, #tpu.memory_space<vmem>>, vector<1x128xf32>
    %c0_i32_6 = arith.constant 0 : i32
    %6 = arith.index_cast %c0_i32_6 : i32 to index
    %c0_7 = arith.constant 0 : index
    %c0_8 = arith.constant 0 : index
    %7 = vector.load %arg1[%6, %c0_7, %c0_8] : memref<8x8x32xbf16, #tpu.memory_space<vmem>>, vector<1x8x32xbf16>
    %8 = vector.shape_cast %7 : vector<1x8x32xbf16> to vector<8x32xbf16>
    %cst = arith.constant dense<0.000000e+00> : vector<8x128xf32>
    %9 = tpu.matmul %8, %3, %cst {dimension_numbers = #tpu.dot_dimension_numbers<[1], [0], [0], [1], [0, 0, 1, 1], [], []>} : vector<8x32xbf16>, vector<32x128xbf16>, vector<8x128xf32> -> vector<8x128xf32>
    %10 = vector.broadcast %5 : vector<1x128xf32> to vector<8x128xf32>
    %11 = arith.addf %9, %10 : vector<8x128xf32>
    %12 = arith.index_cast %c0_i32_6 : i32 to index
    %c0_9 = arith.constant 0 : index
    %c0_10 = arith.constant 0 : index
    %13 = vector.load %arg10[%12, %c0_9, %c0_10] : memref<8x8x128xf32, #tpu.memory_space<vmem>>, vector<1x8x128xf32>
    %14 = vector.shape_cast %13 : vector<1x8x128xf32> to vector<8x128xf32>
    %15 = vector.shape_cast %11 : vector<8x128xf32> to vector<1x8x128xf32>
    tpu.vector_store %arg10[%12, %c0_9, %c0_10], %15 {strides = array<i32>} : memref<8x8x128xf32, #tpu.memory_space<vmem>>, vector<1x8x128xf32>,
    %c1_i32 = arith.constant 1 : i32
    %16 = arith.index_cast %c1_i32 : i32 to index
    %c0_11 = arith.constant 0 : index
    %c0_12 = arith.constant 0 : index
    %17 = vector.load %arg1[%16, %c0_11, %c0_12] : memref<8x8x32xbf16, #tpu.memory_space<vmem>>, vector<1x8x32xbf16>
    %18 = vector.shape_cast %17 : vector<1x8x32xbf16> to vector<8x32xbf16>
    %cst_13 = arith.constant dense<0.000000e+00> : vector<8x128xf32>
    %19 = tpu.matmul %18, %3, %cst_13 {dimension_numbers = #tpu.dot_dimension_numbers<[1], [0], [0], [1], [0, 0, 1, 1], [], []>} : vector<8x32xbf16>, vector<32x128xbf16>, vector<8x128xf32> -> vector<8x128xf32>
    %20 = vector.broadcast %5 : vector<1x128xf32> to vector<8x128xf32>
    %21 = arith.addf %19, %20 : vector<8x128xf32>
    %22 = arith.index_cast %c1_i32 : i32 to index
    %c0_14 = arith.constant 0 : index
    %c0_15 = arith.constant 0 : index
    %23 = vector.load %arg10[%22, %c0_14, %c0_15] : memref<8x8x128xf32, #tpu.memory_space<vmem>>, vector<1x8x128xf32>
    %24 = vector.shape_cast %23 : vector<1x8x128xf32> to vector<8x128xf32>
    %25 = vector.shape_cast %21 : vector<8x128xf32> to vector<1x8x128xf32>
    tpu.vector_store %arg10[%22, %c0_14, %c0_15], %25 {strides = array<i32>} : memref<8x8x128xf32, #tpu.memory_space<vmem>>, vector<1x8x128xf32>,
    %c2_i32 = arith.constant 2 : i32
    %26 = arith.index_cast %c2_i32 : i32 to index
    %c0_16 = arith.constant 0 : index
    %c0_17 = arith.constant 0 : index
    %27 = vector.load %arg1[%26, %c0_16, %c0_17] : memref<8x8x32xbf16, #tpu.memory_space<vmem>>, vector<1x8x32xbf16>
    %28 = vector.shape_cast %27 : vector<1x8x32xbf16> to vector<8x32xbf16>
    %cst_18 = arith.constant dense<0.000000e+00> : vector<8x128xf32>
    %29 = tpu.matmul %28, %3, %cst_18 {dimension_numbers = #tpu.dot_dimension_numbers<[1], [0], [0], [1], [0, 0, 1, 1], [], []>} : vector<8x32xbf16>, vector<32x128xbf16>, vector<8x128xf32> -> vector<8x128xf32>
    %30 = vector.broadcast %5 : vector<1x128xf32> to vector<8x128xf32>
    %31 = arith.addf %29, %30 : vector<8x128xf32>
    %32 = arith.index_cast %c2_i32 : i32 to index
    %c0_19 = arith.constant 0 : index
    %c0_20 = arith.constant 0 : index
    %33 = vector.load %arg10[%32, %c0_19, %c0_20] : memref<8x8x128xf32, #tpu.memory_space<vmem>>, vector<1x8x128xf32>
    %34 = vector.shape_cast %33 : vector<1x8x128xf32> to vector<8x128xf32>
    %35 = vector.shape_cast %31 : vector<8x128xf32> to vector<1x8x128xf32>
    tpu.vector_store %arg10[%32, %c0_19, %c0_20], %35 {strides = array<i32>} : memref<8x8x128xf32, #tpu.memory_space<vmem>>, vector<1x8x128xf32>,
    %c3_i32 = arith.constant 3 : i32
    %36 = arith.index_cast %c3_i32 : i32 to index
    %c0_21 = arith.constant 0 : index
    %c0_22 = arith.constant 0 : index
    %37 = vector.load %arg1[%36, %c0_21, %c0_22] : memref<8x8x32xbf16, #tpu.memory_space<vmem>>, vector<1x8x32xbf16>
    %38 = vector.shape_cast %37 : vector<1x8x32xbf16> to vector<8x32xbf16>
    %cst_23 = arith.constant dense<0.000000e+00> : vector<8x128xf32>
    %39 = tpu.matmul %38, %3, %cst_23 {dimension_numbers = #tpu.dot_dimension_numbers<[1], [0], [0], [1], [0, 0, 1, 1], [], []>} : vector<8x32xbf16>, vector<32x128xbf16>, vector<8x128xf32> -> vector<8x128xf32>
    %40 = vector.broadcast %5 : vector<1x128xf32> to vector<8x128xf32>
    %41 = arith.addf %39, %40 : vector<8x128xf32>
    %42 = arith.index_cast %c3_i32 : i32 to index
    %c0_24 = arith.constant 0 : index
    %c0_25 = arith.constant 0 : index
    %43 = vector.load %arg10[%42, %c0_24, %c0_25] : memref<8x8x128xf32, #tpu.memory_space<vmem>>, vector<1x8x128xf32>
    %44 = vector.shape_cast %43 : vector<1x8x128xf32> to vector<8x128xf32>
    %45 = vector.shape_cast %41 : vector<8x128xf32> to vector<1x8x128xf32>
    tpu.vector_store %arg10[%42, %c0_24, %c0_25], %45 {strides = array<i32>} : memref<8x8x128xf32, #tpu.memory_space<vmem>>, vector<1x8x128xf32>,
    %c4_i32 = arith.constant 4 : i32
    %46 = arith.index_cast %c4_i32 : i32 to index
    %c0_26 = arith.constant 0 : index
    %c0_27 = arith.constant 0 : index
    %47 = vector.load %arg1[%46, %c0_26, %c0_27] : memref<8x8x32xbf16, #tpu.memory_space<vmem>>, vector<1x8x32xbf16>
    %48 = vector.shape_cast %47 : vector<1x8x32xbf16> to vector<8x32xbf16>
    %cst_28 = arith.constant dense<0.000000e+00> : vector<8x128xf32>
    %49 = tpu.matmul %48, %3, %cst_28 {dimension_numbers = #tpu.dot_dimension_numbers<[1], [0], [0], [1], [0, 0, 1, 1], [], []>} : vector<8x32xbf16>, vector<32x128xbf16>, vector<8x128xf32> -> vector<8x128xf32>
    %50 = vector.broadcast %5 : vector<1x128xf32> to vector<8x128xf32>
    %51 = arith.addf %49, %50 : vector<8x128xf32>
    %52 = arith.index_cast %c4_i32 : i32 to index
    %c0_29 = arith.constant 0 : index
    %c0_30 = arith.constant 0 : index
    %53 = vector.load %arg10[%52, %c0_29, %c0_30] : memref<8x8x128xf32, #tpu.memory_space<vmem>>, vector<1x8x128xf32>
    %54 = vector.shape_cast %53 : vector<1x8x128xf32> to vector<8x128xf32>
    %55 = vector.shape_cast %51 : vector<8x128xf32> to vector<1x8x128xf32>
    tpu.vector_store %arg10[%52, %c0_29, %c0_30], %55 {strides = array<i32>} : memref<8x8x128xf32, #tpu.memory_space<vmem>>, vector<1x8x128xf32>,
    %c5_i32 = arith.constant 5 : i32
    %56 = arith.index_cast %c5_i32 : i32 to index
    %c0_31 = arith.constant 0 : index
    %c0_32 = arith.constant 0 : index
    %57 = vector.load %arg1[%56, %c0_31, %c0_32] : memref<8x8x32xbf16, #tpu.memory_space<vmem>>, vector<1x8x32xbf16>
    %58 = vector.shape_cast %57 : vector<1x8x32xbf16> to vector<8x32xbf16>
    %cst_33 = arith.constant dense<0.000000e+00> : vector<8x128xf32>
    %59 = tpu.matmul %58, %3, %cst_33 {dimension_numbers = #tpu.dot_dimension_numbers<[1], [0], [0], [1], [0, 0, 1, 1], [], []>} : vector<8x32xbf16>, vector<32x128xbf16>, vector<8x128xf32> -> vector<8x128xf32>
    %60 = vector.broadcast %5 : vector<1x128xf32> to vector<8x128xf32>
    %61 = arith.addf %59, %60 : vector<8x128xf32>
    %62 = arith.index_cast %c5_i32 : i32 to index
    %c0_34 = arith.constant 0 : index
    %c0_35 = arith.constant 0 : index
    %63 = vector.load %arg10[%62, %c0_34, %c0_35] : memref<8x8x128xf32, #tpu.memory_space<vmem>>, vector<1x8x128xf32>
    %64 = vector.shape_cast %63 : vector<1x8x128xf32> to vector<8x128xf32>
    %65 = vector.shape_cast %61 : vector<8x128xf32> to vector<1x8x128xf32>
    tpu.vector_store %arg10[%62, %c0_34, %c0_35], %65 {strides = array<i32>} : memref<8x8x128xf32, #tpu.memory_space<vmem>>, vector<1x8x128xf32>,
    %c6_i32 = arith.constant 6 : i32
    %66 = arith.index_cast %c6_i32 : i32 to index
    %c0_36 = arith.constant 0 : index
    %c0_37 = arith.constant 0 : index
    %67 = vector.load %arg1[%66, %c0_36, %c0_37] : memref<8x8x32xbf16, #tpu.memory_space<vmem>>, vector<1x8x32xbf16>
    %68 = vector.shape_cast %67 : vector<1x8x32xbf16> to vector<8x32xbf16>
    %cst_38 = arith.constant dense<0.000000e+00> : vector<8x128xf32>
    %69 = tpu.matmul %68, %3, %cst_38 {dimension_numbers = #tpu.dot_dimension_numbers<[1], [0], [0], [1], [0, 0, 1, 1], [], []>} : vector<8x32xbf16>, vector<32x128xbf16>, vector<8x128xf32> -> vector<8x128xf32>
    %70 = vector.broadcast %5 : vector<1x128xf32> to vector<8x128xf32>
    %71 = arith.addf %69, %70 : vector<8x128xf32>
    %72 = arith.index_cast %c6_i32 : i32 to index
    %c0_39 = arith.constant 0 : index
    %c0_40 = arith.constant 0 : index
    %73 = vector.load %arg10[%72, %c0_39, %c0_40] : memref<8x8x128xf32, #tpu.memory_space<vmem>>, vector<1x8x128xf32>
    %74 = vector.shape_cast %73 : vector<1x8x128xf32> to vector<8x128xf32>
    %75 = vector.shape_cast %71 : vector<8x128xf32> to vector<1x8x128xf32>
    tpu.vector_store %arg10[%72, %c0_39, %c0_40], %75 {strides = array<i32>} : memref<8x8x128xf32, #tpu.memory_space<vmem>>, vector<1x8x128xf32>,
    %c7_i32 = arith.constant 7 : i32
    %76 = arith.index_cast %c7_i32 : i32 to index
    %c0_41 = arith.constant 0 : index
    %c0_42 = arith.constant 0 : index
    %77 = vector.load %arg1[%76, %c0_41, %c0_42] : memref<8x8x32xbf16, #tpu.memory_space<vmem>>, vector<1x8x32xbf16>
    %78 = vector.shape_cast %77 : vector<1x8x32xbf16> to vector<8x32xbf16>
    %cst_43 = arith.constant dense<0.000000e+00> : vector<8x128xf32>
    %79 = tpu.matmul %78, %3, %cst_43 {dimension_numbers = #tpu.dot_dimension_numbers<[1], [0], [0], [1], [0, 0, 1, 1], [], []>} : vector<8x32xbf16>, vector<32x128xbf16>, vector<8x128xf32> -> vector<8x128xf32>
    %80 = vector.broadcast %5 : vector<1x128xf32> to vector<8x128xf32>
    %81 = arith.addf %79, %80 : vector<8x128xf32>
    %82 = arith.index_cast %c7_i32 : i32 to index
    %c0_44 = arith.constant 0 : index
    %c0_45 = arith.constant 0 : index
    %83 = vector.load %arg10[%82, %c0_44, %c0_45] : memref<8x8x128xf32, #tpu.memory_space<vmem>>, vector<1x8x128xf32>
    %84 = vector.shape_cast %83 : vector<1x8x128xf32> to vector<8x128xf32>
    %85 = vector.shape_cast %81 : vector<8x128xf32> to vector<1x8x128xf32>
    tpu.vector_store %arg10[%82, %c0_44, %c0_45], %85 {strides = array<i32>} : memref<8x8x128xf32, #tpu.memory_space<vmem>>, vector<1x8x128xf32>,
    %c8_i32 = arith.constant 8 : i32
    %c0_46 = arith.constant 0 : index
    %c0_47 = arith.constant 0 : index
    %86 = vector.load %arg6[%c0_46, %c0_47] : memref<8x32xf32, #tpu.memory_space<vmem>>, vector<8x32xf32>
    %c0_48 = arith.constant 0 : index
    %c0_49 = arith.constant 0 : index
    %87 = vector.load %arg7[%c0_48, %c0_49] : memref<8x32xf32, #tpu.memory_space<vmem>>, vector<8x32xf32>
    %c0_i32_50 = arith.constant 0 : i32
    %88 = arith.index_cast %c0_i32_50 : i32 to index
    %c0_51 = arith.constant 0 : index
    %c0_52 = arith.constant 0 : index
    %89 = vector.load %arg10[%88, %c0_51, %c0_52] : memref<8x8x128xf32, #tpu.memory_space<vmem>>, vector<1x8x128xf32>
    %90 = vector.shape_cast %89 : vector<1x8x128xf32> to vector<8x128xf32>
    %91 = arith.truncf %86 : vector<8x32xf32> to vector<8x32xbf16>
    %cst_53 = arith.constant dense<0.000000e+00> : vector<8x128xf32>
    %92 = tpu.matmul %91, %4, %cst_53 {dimension_numbers = #tpu.dot_dimension_numbers<[1], [0], [0], [1], [0, 0, 1, 1], [], []>} : vector<8x32xbf16>, vector<32x128xbf16>, vector<8x128xf32> -> vector<8x128xf32>
    %93 = arith.addf %90, %92 : vector<8x128xf32>
    %94 = arith.negf %93 : vector<8x128xf32>
    %95 = math.exp %94 : vector<8x128xf32>
    %cst_54 = arith.constant 1.000000e+00 : f32
    %96 = vector.broadcast %cst_54 : f32 to vector<8x128xf32>
    %97 = arith.addf %96, %95 : vector<8x128xf32>
    %98 = arith.divf %96, %97 : vector<8x128xf32>
    %99 = vector.extract_strided_slice %98 {offsets = [0, 0], sizes = [8, 32], strides = [1, 1]} : vector<8x128xf32> to vector<8x32xf32>
    %c96_i32 = arith.constant 96 : i32
    %100 = tpu.dynamic_rotate %98 by %c96_i32 dim 1 : vector<8x128xf32>, i32 -> vector<8x128xf32>
    %101 = vector.extract_strided_slice %100 {offsets = [0, 0], sizes = [8, 32], strides = [1, 1]} : vector<8x128xf32> to vector<8x32xf32>
    %c64_i32 = arith.constant 64 : i32
    %102 = tpu.dynamic_rotate %98 by %c64_i32 dim 1 : vector<8x128xf32>, i32 -> vector<8x128xf32>
    %103 = vector.extract_strided_slice %102 {offsets = [0, 0], sizes = [8, 32], strides = [1, 1]} : vector<8x128xf32> to vector<8x32xf32>
    %c32_i32 = arith.constant 32 : i32
    %104 = tpu.dynamic_rotate %93 by %c32_i32 dim 1 : vector<8x128xf32>, i32 -> vector<8x128xf32>
    %105 = vector.extract_strided_slice %104 {offsets = [0, 0], sizes = [8, 32], strides = [1, 1]} : vector<8x128xf32> to vector<8x32xf32>
    %106 = math.tanh %105 : vector<8x32xf32>
    %107 = arith.mulf %101, %87 : vector<8x32xf32>
    %108 = arith.mulf %99, %106 : vector<8x32xf32>
    %109 = arith.addf %107, %108 : vector<8x32xf32>
    %110 = math.tanh %109 : vector<8x32xf32>
    %111 = arith.mulf %103, %110 : vector<8x32xf32>
    %112 = arith.truncf %111 : vector<8x32xf32> to vector<8x32xbf16>
    %113 = arith.index_cast %c0_i32_50 : i32 to index
    %c0_55 = arith.constant 0 : index
    %c0_56 = arith.constant 0 : index
    %114 = vector.load %arg5[%113, %c0_55, %c0_56] : memref<8x8x32xbf16, #tpu.memory_space<vmem>>, vector<1x8x32xbf16>
    %115 = vector.shape_cast %114 : vector<1x8x32xbf16> to vector<8x32xbf16>
    %116 = vector.shape_cast %112 : vector<8x32xbf16> to vector<1x8x32xbf16>
    tpu.vector_store %arg5[%113, %c0_55, %c0_56], %116 {strides = array<i32>} : memref<8x8x32xbf16, #tpu.memory_space<vmem>>, vector<1x8x32xbf16>,
    %c1_i32_57 = arith.constant 1 : i32
    %117 = arith.index_cast %c1_i32_57 : i32 to index
    %c0_58 = arith.constant 0 : index
    %c0_59 = arith.constant 0 : index
    %118 = vector.load %arg10[%117, %c0_58, %c0_59] : memref<8x8x128xf32, #tpu.memory_space<vmem>>, vector<1x8x128xf32>
    %119 = vector.shape_cast %118 : vector<1x8x128xf32> to vector<8x128xf32>
    %120 = arith.truncf %111 : vector<8x32xf32> to vector<8x32xbf16>
    %cst_60 = arith.constant dense<0.000000e+00> : vector<8x128xf32>
    %121 = tpu.matmul %120, %4, %cst_60 {dimension_numbers = #tpu.dot_dimension_numbers<[1], [0], [0], [1], [0, 0, 1, 1], [], []>} : vector<8x32xbf16>, vector<32x128xbf16>, vector<8x128xf32> -> vector<8x128xf32>
    %122 = arith.addf %119, %121 : vector<8x128xf32>
    %123 = arith.negf %122 : vector<8x128xf32>
    %124 = math.exp %123 : vector<8x128xf32>
    %cst_61 = arith.constant 1.000000e+00 : f32
    %125 = vector.broadcast %cst_61 : f32 to vector<8x128xf32>
    %126 = arith.addf %125, %124 : vector<8x128xf32>
    %127 = arith.divf %125, %126 : vector<8x128xf32>
    %128 = vector.extract_strided_slice %127 {offsets = [0, 0], sizes = [8, 32], strides = [1, 1]} : vector<8x128xf32> to vector<8x32xf32>
    %c96_i32_62 = arith.constant 96 : i32
    %129 = tpu.dynamic_rotate %127 by %c96_i32_62 dim 1 : vector<8x128xf32>, i32 -> vector<8x128xf32>
    %130 = vector.extract_strided_slice %129 {offsets = [0, 0], sizes = [8, 32], strides = [1, 1]} : vector<8x128xf32> to vector<8x32xf32>
    %c64_i32_63 = arith.constant 64 : i32
    %131 = tpu.dynamic_rotate %127 by %c64_i32_63 dim 1 : vector<8x128xf32>, i32 -> vector<8x128xf32>
    %132 = vector.extract_strided_slice %131 {offsets = [0, 0], sizes = [8, 32], strides = [1, 1]} : vector<8x128xf32> to vector<8x32xf32>
    %c32_i32_64 = arith.constant 32 : i32
    %133 = tpu.dynamic_rotate %122 by %c32_i32_64 dim 1 : vector<8x128xf32>, i32 -> vector<8x128xf32>
    %134 = vector.extract_strided_slice %133 {offsets = [0, 0], sizes = [8, 32], strides = [1, 1]} : vector<8x128xf32> to vector<8x32xf32>
    %135 = math.tanh %134 : vector<8x32xf32>
    %136 = arith.mulf %130, %109 : vector<8x32xf32>
    %137 = arith.mulf %128, %135 : vector<8x32xf32>
    %138 = arith.addf %136, %137 : vector<8x32xf32>
    %139 = math.tanh %138 : vector<8x32xf32>
    %140 = arith.mulf %132, %139 : vector<8x32xf32>
    %141 = arith.truncf %140 : vector<8x32xf32> to vector<8x32xbf16>
    %142 = arith.index_cast %c1_i32_57 : i32 to index
    %c0_65 = arith.constant 0 : index
    %c0_66 = arith.constant 0 : index
    %143 = vector.load %arg5[%142, %c0_65, %c0_66] : memref<8x8x32xbf16, #tpu.memory_space<vmem>>, vector<1x8x32xbf16>
    %144 = vector.shape_cast %143 : vector<1x8x32xbf16> to vector<8x32xbf16>
    %145 = vector.shape_cast %141 : vector<8x32xbf16> to vector<1x8x32xbf16>
    tpu.vector_store %arg5[%142, %c0_65, %c0_66], %145 {strides = array<i32>} : memref<8x8x32xbf16, #tpu.memory_space<vmem>>, vector<1x8x32xbf16>,
    %c2_i32_67 = arith.constant 2 : i32
    %146 = arith.index_cast %c2_i32_67 : i32 to index
    %c0_68 = arith.constant 0 : index
    %c0_69 = arith.constant 0 : index
    %147 = vector.load %arg10[%146, %c0_68, %c0_69] : memref<8x8x128xf32, #tpu.memory_space<vmem>>, vector<1x8x128xf32>
    %148 = vector.shape_cast %147 : vector<1x8x128xf32> to vector<8x128xf32>
    %149 = arith.truncf %140 : vector<8x32xf32> to vector<8x32xbf16>
    %cst_70 = arith.constant dense<0.000000e+00> : vector<8x128xf32>
    %150 = tpu.matmul %149, %4, %cst_70 {dimension_numbers = #tpu.dot_dimension_numbers<[1], [0], [0], [1], [0, 0, 1, 1], [], []>} : vector<8x32xbf16>, vector<32x128xbf16>, vector<8x128xf32> -> vector<8x128xf32>
    %151 = arith.addf %148, %150 : vector<8x128xf32>
    %152 = arith.negf %151 : vector<8x128xf32>
    %153 = math.exp %152 : vector<8x128xf32>
    %cst_71 = arith.constant 1.000000e+00 : f32
    %154 = vector.broadcast %cst_71 : f32 to vector<8x128xf32>
    %155 = arith.addf %154, %153 : vector<8x128xf32>
    %156 = arith.divf %154, %155 : vector<8x128xf32>
    %157 = vector.extract_strided_slice %156 {offsets = [0, 0], sizes = [8, 32], strides = [1, 1]} : vector<8x128xf32> to vector<8x32xf32>
    %c96_i32_72 = arith.constant 96 : i32
    %158 = tpu.dynamic_rotate %156 by %c96_i32_72 dim 1 : vector<8x128xf32>, i32 -> vector<8x128xf32>
    %159 = vector.extract_strided_slice %158 {offsets = [0, 0], sizes = [8, 32], strides = [1, 1]} : vector<8x128xf32> to vector<8x32xf32>
    %c64_i32_73 = arith.constant 64 : i32
    %160 = tpu.dynamic_rotate %156 by %c64_i32_73 dim 1 : vector<8x128xf32>, i32 -> vector<8x128xf32>
    %161 = vector.extract_strided_slice %160 {offsets = [0, 0], sizes = [8, 32], strides = [1, 1]} : vector<8x128xf32> to vector<8x32xf32>
    %c32_i32_74 = arith.constant 32 : i32
    %162 = tpu.dynamic_rotate %151 by %c32_i32_74 dim 1 : vector<8x128xf32>, i32 -> vector<8x128xf32>
    %163 = vector.extract_strided_slice %162 {offsets = [0, 0], sizes = [8, 32], strides = [1, 1]} : vector<8x128xf32> to vector<8x32xf32>
    %164 = math.tanh %163 : vector<8x32xf32>
    %165 = arith.mulf %159, %138 : vector<8x32xf32>
    %166 = arith.mulf %157, %164 : vector<8x32xf32>
    %167 = arith.addf %165, %166 : vector<8x32xf32>
    %168 = math.tanh %167 : vector<8x32xf32>
    %169 = arith.mulf %161, %168 : vector<8x32xf32>
    %170 = arith.truncf %169 : vector<8x32xf32> to vector<8x32xbf16>
    %171 = arith.index_cast %c2_i32_67 : i32 to index
    %c0_75 = arith.constant 0 : index
    %c0_76 = arith.constant 0 : index
    %172 = vector.load %arg5[%171, %c0_75, %c0_76] : memref<8x8x32xbf16, #tpu.memory_space<vmem>>, vector<1x8x32xbf16>
    %173 = vector.shape_cast %172 : vector<1x8x32xbf16> to vector<8x32xbf16>
    %174 = vector.shape_cast %170 : vector<8x32xbf16> to vector<1x8x32xbf16>
    tpu.vector_store %arg5[%171, %c0_75, %c0_76], %174 {strides = array<i32>} : memref<8x8x32xbf16, #tpu.memory_space<vmem>>, vector<1x8x32xbf16>,
    %c3_i32_77 = arith.constant 3 : i32
    %175 = arith.index_cast %c3_i32_77 : i32 to index
    %c0_78 = arith.constant 0 : index
    %c0_79 = arith.constant 0 : index
    %176 = vector.load %arg10[%175, %c0_78, %c0_79] : memref<8x8x128xf32, #tpu.memory_space<vmem>>, vector<1x8x128xf32>
    %177 = vector.shape_cast %176 : vector<1x8x128xf32> to vector<8x128xf32>
    %178 = arith.truncf %169 : vector<8x32xf32> to vector<8x32xbf16>
    %cst_80 = arith.constant dense<0.000000e+00> : vector<8x128xf32>
    %179 = tpu.matmul %178, %4, %cst_80 {dimension_numbers = #tpu.dot_dimension_numbers<[1], [0], [0], [1], [0, 0, 1, 1], [], []>} : vector<8x32xbf16>, vector<32x128xbf16>, vector<8x128xf32> -> vector<8x128xf32>
    %180 = arith.addf %177, %179 : vector<8x128xf32>
    %181 = arith.negf %180 : vector<8x128xf32>
    %182 = math.exp %181 : vector<8x128xf32>
    %cst_81 = arith.constant 1.000000e+00 : f32
    %183 = vector.broadcast %cst_81 : f32 to vector<8x128xf32>
    %184 = arith.addf %183, %182 : vector<8x128xf32>
    %185 = arith.divf %183, %184 : vector<8x128xf32>
    %186 = vector.extract_strided_slice %185 {offsets = [0, 0], sizes = [8, 32], strides = [1, 1]} : vector<8x128xf32> to vector<8x32xf32>
    %c96_i32_82 = arith.constant 96 : i32
    %187 = tpu.dynamic_rotate %185 by %c96_i32_82 dim 1 : vector<8x128xf32>, i32 -> vector<8x128xf32>
    %188 = vector.extract_strided_slice %187 {offsets = [0, 0], sizes = [8, 32], strides = [1, 1]} : vector<8x128xf32> to vector<8x32xf32>
    %c64_i32_83 = arith.constant 64 : i32
    %189 = tpu.dynamic_rotate %185 by %c64_i32_83 dim 1 : vector<8x128xf32>, i32 -> vector<8x128xf32>
    %190 = vector.extract_strided_slice %189 {offsets = [0, 0], sizes = [8, 32], strides = [1, 1]} : vector<8x128xf32> to vector<8x32xf32>
    %c32_i32_84 = arith.constant 32 : i32
    %191 = tpu.dynamic_rotate %180 by %c32_i32_84 dim 1 : vector<8x128xf32>, i32 -> vector<8x128xf32>
    %192 = vector.extract_strided_slice %191 {offsets = [0, 0], sizes = [8, 32], strides = [1, 1]} : vector<8x128xf32> to vector<8x32xf32>
    %193 = math.tanh %192 : vector<8x32xf32>
    %194 = arith.mulf %188, %167 : vector<8x32xf32>
    %195 = arith.mulf %186, %193 : vector<8x32xf32>
    %196 = arith.addf %194, %195 : vector<8x32xf32>
    %197 = math.tanh %196 : vector<8x32xf32>
    %198 = arith.mulf %190, %197 : vector<8x32xf32>
    %199 = arith.truncf %198 : vector<8x32xf32> to vector<8x32xbf16>
    %200 = arith.index_cast %c3_i32_77 : i32 to index
    %c0_85 = arith.constant 0 : index
    %c0_86 = arith.constant 0 : index
    %201 = vector.load %arg5[%200, %c0_85, %c0_86] : memref<8x8x32xbf16, #tpu.memory_space<vmem>>, vector<1x8x32xbf16>
    %202 = vector.shape_cast %201 : vector<1x8x32xbf16> to vector<8x32xbf16>
    %203 = vector.shape_cast %199 : vector<8x32xbf16> to vector<1x8x32xbf16>
    tpu.vector_store %arg5[%200, %c0_85, %c0_86], %203 {strides = array<i32>} : memref<8x8x32xbf16, #tpu.memory_space<vmem>>, vector<1x8x32xbf16>,
    %c4_i32_87 = arith.constant 4 : i32
    %204 = arith.index_cast %c4_i32_87 : i32 to index
    %c0_88 = arith.constant 0 : index
    %c0_89 = arith.constant 0 : index
    %205 = vector.load %arg10[%204, %c0_88, %c0_89] : memref<8x8x128xf32, #tpu.memory_space<vmem>>, vector<1x8x128xf32>
    %206 = vector.shape_cast %205 : vector<1x8x128xf32> to vector<8x128xf32>
    %207 = arith.truncf %198 : vector<8x32xf32> to vector<8x32xbf16>
    %cst_90 = arith.constant dense<0.000000e+00> : vector<8x128xf32>
    %208 = tpu.matmul %207, %4, %cst_90 {dimension_numbers = #tpu.dot_dimension_numbers<[1], [0], [0], [1], [0, 0, 1, 1], [], []>} : vector<8x32xbf16>, vector<32x128xbf16>, vector<8x128xf32> -> vector<8x128xf32>
    %209 = arith.addf %206, %208 : vector<8x128xf32>
    %210 = arith.negf %209 : vector<8x128xf32>
    %211 = math.exp %210 : vector<8x128xf32>
    %cst_91 = arith.constant 1.000000e+00 : f32
    %212 = vector.broadcast %cst_91 : f32 to vector<8x128xf32>
    %213 = arith.addf %212, %211 : vector<8x128xf32>
    %214 = arith.divf %212, %213 : vector<8x128xf32>
    %215 = vector.extract_strided_slice %214 {offsets = [0, 0], sizes = [8, 32], strides = [1, 1]} : vector<8x128xf32> to vector<8x32xf32>
    %c96_i32_92 = arith.constant 96 : i32
    %216 = tpu.dynamic_rotate %214 by %c96_i32_92 dim 1 : vector<8x128xf32>, i32 -> vector<8x128xf32>
    %217 = vector.extract_strided_slice %216 {offsets = [0, 0], sizes = [8, 32], strides = [1, 1]} : vector<8x128xf32> to vector<8x32xf32>
    %c64_i32_93 = arith.constant 64 : i32
    %218 = tpu.dynamic_rotate %214 by %c64_i32_93 dim 1 : vector<8x128xf32>, i32 -> vector<8x128xf32>
    %219 = vector.extract_strided_slice %218 {offsets = [0, 0], sizes = [8, 32], strides = [1, 1]} : vector<8x128xf32> to vector<8x32xf32>
    %c32_i32_94 = arith.constant 32 : i32
    %220 = tpu.dynamic_rotate %209 by %c32_i32_94 dim 1 : vector<8x128xf32>, i32 -> vector<8x128xf32>
    %221 = vector.extract_strided_slice %220 {offsets = [0, 0], sizes = [8, 32], strides = [1, 1]} : vector<8x128xf32> to vector<8x32xf32>
    %222 = math.tanh %221 : vector<8x32xf32>
    %223 = arith.mulf %217, %196 : vector<8x32xf32>
    %224 = arith.mulf %215, %222 : vector<8x32xf32>
    %225 = arith.addf %223, %224 : vector<8x32xf32>
    %226 = math.tanh %225 : vector<8x32xf32>
    %227 = arith.mulf %219, %226 : vector<8x32xf32>
    %228 = arith.truncf %227 : vector<8x32xf32> to vector<8x32xbf16>
    %229 = arith.index_cast %c4_i32_87 : i32 to index
    %c0_95 = arith.constant 0 : index
    %c0_96 = arith.constant 0 : index
    %230 = vector.load %arg5[%229, %c0_95, %c0_96] : memref<8x8x32xbf16, #tpu.memory_space<vmem>>, vector<1x8x32xbf16>
    %231 = vector.shape_cast %230 : vector<1x8x32xbf16> to vector<8x32xbf16>
    %232 = vector.shape_cast %228 : vector<8x32xbf16> to vector<1x8x32xbf16>
    tpu.vector_store %arg5[%229, %c0_95, %c0_96], %232 {strides = array<i32>} : memref<8x8x32xbf16, #tpu.memory_space<vmem>>, vector<1x8x32xbf16>,
    %c5_i32_97 = arith.constant 5 : i32
    %233 = arith.index_cast %c5_i32_97 : i32 to index
    %c0_98 = arith.constant 0 : index
    %c0_99 = arith.constant 0 : index
    %234 = vector.load %arg10[%233, %c0_98, %c0_99] : memref<8x8x128xf32, #tpu.memory_space<vmem>>, vector<1x8x128xf32>
    %235 = vector.shape_cast %234 : vector<1x8x128xf32> to vector<8x128xf32>
    %236 = arith.truncf %227 : vector<8x32xf32> to vector<8x32xbf16>
    %cst_100 = arith.constant dense<0.000000e+00> : vector<8x128xf32>
    %237 = tpu.matmul %236, %4, %cst_100 {dimension_numbers = #tpu.dot_dimension_numbers<[1], [0], [0], [1], [0, 0, 1, 1], [], []>} : vector<8x32xbf16>, vector<32x128xbf16>, vector<8x128xf32> -> vector<8x128xf32>
    %238 = arith.addf %235, %237 : vector<8x128xf32>
    %239 = arith.negf %238 : vector<8x128xf32>
    %240 = math.exp %239 : vector<8x128xf32>
    %cst_101 = arith.constant 1.000000e+00 : f32
    %241 = vector.broadcast %cst_101 : f32 to vector<8x128xf32>
    %242 = arith.addf %241, %240 : vector<8x128xf32>
    %243 = arith.divf %241, %242 : vector<8x128xf32>
    %244 = vector.extract_strided_slice %243 {offsets = [0, 0], sizes = [8, 32], strides = [1, 1]} : vector<8x128xf32> to vector<8x32xf32>
    %c96_i32_102 = arith.constant 96 : i32
    %245 = tpu.dynamic_rotate %243 by %c96_i32_102 dim 1 : vector<8x128xf32>, i32 -> vector<8x128xf32>
    %246 = vector.extract_strided_slice %245 {offsets = [0, 0], sizes = [8, 32], strides = [1, 1]} : vector<8x128xf32> to vector<8x32xf32>
    %c64_i32_103 = arith.constant 64 : i32
    %247 = tpu.dynamic_rotate %243 by %c64_i32_103 dim 1 : vector<8x128xf32>, i32 -> vector<8x128xf32>
    %248 = vector.extract_strided_slice %247 {offsets = [0, 0], sizes = [8, 32], strides = [1, 1]} : vector<8x128xf32> to vector<8x32xf32>
    %c32_i32_104 = arith.constant 32 : i32
    %249 = tpu.dynamic_rotate %238 by %c32_i32_104 dim 1 : vector<8x128xf32>, i32 -> vector<8x128xf32>
    %250 = vector.extract_strided_slice %249 {offsets = [0, 0], sizes = [8, 32], strides = [1, 1]} : vector<8x128xf32> to vector<8x32xf32>
    %251 = math.tanh %250 : vector<8x32xf32>
    %252 = arith.mulf %246, %225 : vector<8x32xf32>
    %253 = arith.mulf %244, %251 : vector<8x32xf32>
    %254 = arith.addf %252, %253 : vector<8x32xf32>
    %255 = math.tanh %254 : vector<8x32xf32>
    %256 = arith.mulf %248, %255 : vector<8x32xf32>
    %257 = arith.truncf %256 : vector<8x32xf32> to vector<8x32xbf16>
    %258 = arith.index_cast %c5_i32_97 : i32 to index
    %c0_105 = arith.constant 0 : index
    %c0_106 = arith.constant 0 : index
    %259 = vector.load %arg5[%258, %c0_105, %c0_106] : memref<8x8x32xbf16, #tpu.memory_space<vmem>>, vector<1x8x32xbf16>
    %260 = vector.shape_cast %259 : vector<1x8x32xbf16> to vector<8x32xbf16>
    %261 = vector.shape_cast %257 : vector<8x32xbf16> to vector<1x8x32xbf16>
    tpu.vector_store %arg5[%258, %c0_105, %c0_106], %261 {strides = array<i32>} : memref<8x8x32xbf16, #tpu.memory_space<vmem>>, vector<1x8x32xbf16>,
    %c6_i32_107 = arith.constant 6 : i32
    %262 = arith.index_cast %c6_i32_107 : i32 to index
    %c0_108 = arith.constant 0 : index
    %c0_109 = arith.constant 0 : index
    %263 = vector.load %arg10[%262, %c0_108, %c0_109] : memref<8x8x128xf32, #tpu.memory_space<vmem>>, vector<1x8x128xf32>
    %264 = vector.shape_cast %263 : vector<1x8x128xf32> to vector<8x128xf32>
    %265 = arith.truncf %256 : vector<8x32xf32> to vector<8x32xbf16>
    %cst_110 = arith.constant dense<0.000000e+00> : vector<8x128xf32>
    %266 = tpu.matmul %265, %4, %cst_110 {dimension_numbers = #tpu.dot_dimension_numbers<[1], [0], [0], [1], [0, 0, 1, 1], [], []>} : vector<8x32xbf16>, vector<32x128xbf16>, vector<8x128xf32> -> vector<8x128xf32>
    %267 = arith.addf %264, %266 : vector<8x128xf32>
    %268 = arith.negf %267 : vector<8x128xf32>
    %269 = math.exp %268 : vector<8x128xf32>
    %cst_111 = arith.constant 1.000000e+00 : f32
    %270 = vector.broadcast %cst_111 : f32 to vector<8x128xf32>
    %271 = arith.addf %270, %269 : vector<8x128xf32>
    %272 = arith.divf %270, %271 : vector<8x128xf32>
    %273 = vector.extract_strided_slice %272 {offsets = [0, 0], sizes = [8, 32], strides = [1, 1]} : vector<8x128xf32> to vector<8x32xf32>
    %c96_i32_112 = arith.constant 96 : i32
    %274 = tpu.dynamic_rotate %272 by %c96_i32_112 dim 1 : vector<8x128xf32>, i32 -> vector<8x128xf32>
    %275 = vector.extract_strided_slice %274 {offsets = [0, 0], sizes = [8, 32], strides = [1, 1]} : vector<8x128xf32> to vector<8x32xf32>
    %c64_i32_113 = arith.constant 64 : i32
    %276 = tpu.dynamic_rotate %272 by %c64_i32_113 dim 1 : vector<8x128xf32>, i32 -> vector<8x128xf32>
    %277 = vector.extract_strided_slice %276 {offsets = [0, 0], sizes = [8, 32], strides = [1, 1]} : vector<8x128xf32> to vector<8x32xf32>
    %c32_i32_114 = arith.constant 32 : i32
    %278 = tpu.dynamic_rotate %267 by %c32_i32_114 dim 1 : vector<8x128xf32>, i32 -> vector<8x128xf32>
    %279 = vector.extract_strided_slice %278 {offsets = [0, 0], sizes = [8, 32], strides = [1, 1]} : vector<8x128xf32> to vector<8x32xf32>
    %280 = math.tanh %279 : vector<8x32xf32>
    %281 = arith.mulf %275, %254 : vector<8x32xf32>
    %282 = arith.mulf %273, %280 : vector<8x32xf32>
    %283 = arith.addf %281, %282 : vector<8x32xf32>
    %284 = math.tanh %283 : vector<8x32xf32>
    %285 = arith.mulf %277, %284 : vector<8x32xf32>
    %286 = arith.truncf %285 : vector<8x32xf32> to vector<8x32xbf16>
    %287 = arith.index_cast %c6_i32_107 : i32 to index
    %c0_115 = arith.constant 0 : index
    %c0_116 = arith.constant 0 : index
    %288 = vector.load %arg5[%287, %c0_115, %c0_116] : memref<8x8x32xbf16, #tpu.memory_space<vmem>>, vector<1x8x32xbf16>
    %289 = vector.shape_cast %288 : vector<1x8x32xbf16> to vector<8x32xbf16>
    %290 = vector.shape_cast %286 : vector<8x32xbf16> to vector<1x8x32xbf16>
    tpu.vector_store %arg5[%287, %c0_115, %c0_116], %290 {strides = array<i32>} : memref<8x8x32xbf16, #tpu.memory_space<vmem>>, vector<1x8x32xbf16>,
    %c7_i32_117 = arith.constant 7 : i32
    %291 = arith.index_cast %c7_i32_117 : i32 to index
    %c0_118 = arith.constant 0 : index
    %c0_119 = arith.constant 0 : index
    %292 = vector.load %arg10[%291, %c0_118, %c0_119] : memref<8x8x128xf32, #tpu.memory_space<vmem>>, vector<1x8x128xf32>
    %293 = vector.shape_cast %292 : vector<1x8x128xf32> to vector<8x128xf32>
    %294 = arith.truncf %285 : vector<8x32xf32> to vector<8x32xbf16>
    %cst_120 = arith.constant dense<0.000000e+00> : vector<8x128xf32>
    %295 = tpu.matmul %294, %4, %cst_120 {dimension_numbers = #tpu.dot_dimension_numbers<[1], [0], [0], [1], [0, 0, 1, 1], [], []>} : vector<8x32xbf16>, vector<32x128xbf16>, vector<8x128xf32> -> vector<8x128xf32>
    %296 = arith.addf %293, %295 : vector<8x128xf32>
    %297 = arith.negf %296 : vector<8x128xf32>
    %298 = math.exp %297 : vector<8x128xf32>
    %cst_121 = arith.constant 1.000000e+00 : f32
    %299 = vector.broadcast %cst_121 : f32 to vector<8x128xf32>
    %300 = arith.addf %299, %298 : vector<8x128xf32>
    %301 = arith.divf %299, %300 : vector<8x128xf32>
    %302 = vector.extract_strided_slice %301 {offsets = [0, 0], sizes = [8, 32], strides = [1, 1]} : vector<8x128xf32> to vector<8x32xf32>
    %c96_i32_122 = arith.constant 96 : i32
    %303 = tpu.dynamic_rotate %301 by %c96_i32_122 dim 1 : vector<8x128xf32>, i32 -> vector<8x128xf32>
    %304 = vector.extract_strided_slice %303 {offsets = [0, 0], sizes = [8, 32], strides = [1, 1]} : vector<8x128xf32> to vector<8x32xf32>
    %c64_i32_123 = arith.constant 64 : i32
    %305 = tpu.dynamic_rotate %301 by %c64_i32_123 dim 1 : vector<8x128xf32>, i32 -> vector<8x128xf32>
    %306 = vector.extract_strided_slice %305 {offsets = [0, 0], sizes = [8, 32], strides = [1, 1]} : vector<8x128xf32> to vector<8x32xf32>
    %c32_i32_124 = arith.constant 32 : i32
    %307 = tpu.dynamic_rotate %296 by %c32_i32_124 dim 1 : vector<8x128xf32>, i32 -> vector<8x128xf32>
    %308 = vector.extract_strided_slice %307 {offsets = [0, 0], sizes = [8, 32], strides = [1, 1]} : vector<8x128xf32> to vector<8x32xf32>
    %309 = math.tanh %308 : vector<8x32xf32>
    %310 = arith.mulf %304, %283 : vector<8x32xf32>
    %311 = arith.mulf %302, %309 : vector<8x32xf32>
    %312 = arith.addf %310, %311 : vector<8x32xf32>
    %313 = math.tanh %312 : vector<8x32xf32>
    %314 = arith.mulf %306, %313 : vector<8x32xf32>
    %315 = arith.truncf %314 : vector<8x32xf32> to vector<8x32xbf16>
    %316 = arith.index_cast %c7_i32_117 : i32 to index
    %c0_125 = arith.constant 0 : index
    %c0_126 = arith.constant 0 : index
    %317 = vector.load %arg5[%316, %c0_125, %c0_126] : memref<8x8x32xbf16, #tpu.memory_space<vmem>>, vector<1x8x32xbf16>
    %318 = vector.shape_cast %317 : vector<1x8x32xbf16> to vector<8x32xbf16>
    %319 = vector.shape_cast %315 : vector<8x32xbf16> to vector<1x8x32xbf16>
    tpu.vector_store %arg5[%316, %c0_125, %c0_126], %319 {strides = array<i32>} : memref<8x8x32xbf16, #tpu.memory_space<vmem>>, vector<1x8x32xbf16>,
    %c8_i32_127 = arith.constant 8 : i32
    %c0_128 = arith.constant 0 : index
    %c0_129 = arith.constant 0 : index
    %320 = vector.load %arg6[%c0_128, %c0_129] : memref<8x32xf32, #tpu.memory_space<vmem>>, vector<8x32xf32>
    tpu.vector_store %arg6[%c0_128, %c0_129], %314 {strides = array<i32>} : memref<8x32xf32, #tpu.memory_space<vmem>>, vector<8x32xf32>,
    %c0_130 = arith.constant 0 : index
    %c0_131 = arith.constant 0 : index
    %321 = vector.load %arg7[%c0_130, %c0_131] : memref<8x32xf32, #tpu.memory_space<vmem>>, vector<8x32xf32>
    tpu.vector_store %arg7[%c0_130, %c0_131], %312 {strides = array<i32>} : memref<8x32xf32, #tpu.memory_space<vmem>>, vector<8x32xf32>,
    return
  }
  func.func @transform_0(%arg0: i32) -> (i32, i32, i32) {
    %c0_i32 = arith.constant 0 : i32
    %c0_i32_0 = arith.constant 0 : i32
    %c0_i32_1 = arith.constant 0 : i32
    return %arg0, %c0_i32, %c0_i32_0 : i32, i32, i32
  }
  func.func @transform_3(%arg0: i32) -> (i32, i32) {
    %c0_i32 = arith.constant 0 : i32
    %c0_i32_0 = arith.constant 0 : i32
    %c0_i32_1 = arith.constant 0 : i32
    return %c0_i32, %c0_i32_0 : i32, i32
  }
  func.func @transform_4(%arg0: i32) -> (i32, i32, i32) {
    %c0_i32 = arith.constant 0 : i32
    %c0_i32_0 = arith.constant 0 : i32
    %c0_i32_1 = arith.constant 0 : i32
    return %arg0, %c0_i32, %c0_i32_0 : i32, i32, i32
  }
  func.func @transform_5(%arg0: i32) -> (i32, i32) {
    %c0_i32 = arith.constant 0 : i32
    %c0_i32_0 = arith.constant 0 : i32
    %c0_i32_1 = arith.constant 0 : i32
    return %c0_i32, %c0_i32_0 : i32, i32
  }
  func.func @transform_6(%arg0: i32) -> (i32, i32) {
    %c0_i32 = arith.constant 0 : i32
    %c0_i32_0 = arith.constant 0 : i32
    %c0_i32_1 = arith.constant 0 : i32
    return %c0_i32, %c0_i32_0 : i32, i32
  }
}

</mosaic_0001>

<bundles_post_ra>
// kernel: tpu_custom_call.1
= control target key start
LH: loop header
LB: loop body
LE: loop exit
PB: predicated region body
PF: predicated region fallthrough
CT: control target
= control target key end

     0   :  { %12 = vsyncpa [#allocation7], 0  ;;  %s1816_s0 = inlined_call_operand.hbm [shape: bf16[8,8,32], index: 0, kind: input, shape index: {}]   ;;  %s1817_s1 = inlined_call_operand.hbm [shape: bf16[32,128], index: 1, kind: input, shape index: {}]   ;;  %s1818_s2 = inlined_call_operand.hbm [shape: bf16[32,128], index: 2, kind: input, shape index: {}]   ;;  %s1819_s3 = inlined_call_operand.vmem [shape: f32[1,128], index: 3, kind: input, shape index: {}]   ;;  %s1820_s4 = inlined_call_operand.hbm [shape: bf16[8,8,32], index: 4, kind: output, shape index: {0}]   ;;  %s1821_s5 = inlined_call_operand.hbm [shape: f32[8,32], index: 5, kind: output, shape index: {1}]   ;;  %s1822_s6 = inlined_call_operand.hbm [shape: f32[8,32], index: 6, kind: output, shape index: {2}]  }
   0x1   :  { %13 = vsyncpa [#allocation8], 0 }
   0x2   :  { %14 = vsyncpa [#allocation11], 0  ;;  %s1506_s21 = smov [#allocation6]   ;;  %s1364_s25 = scalar_lea.hbm %s1816_s0, 512 }
   0x3   :  { %s20_s22 = sshll.u32 %s1506_s21, 4  ;;  %p1365_p0 = scmp.ne.s32.totalorder %s1816_s0, %s1364_s25  ;;  %s21_s22 = int_to_ptr.vmem [resolvable:$true] %s20_s22 }
   0x4   :  { %p1368_p1 = scmp.lt.u32.totalorder %s1364_s25, %s1816_s0 }
   0x6   :  { %p1370_p2 = pnand %p1368_p1, %p1365_p0 }
   0x8   :  { %1373 = shalt.err (!%p1370_p2)
}
   0x9   :  { %s1374_s30 = scalar_lea.vmem %s21_s22, 512  ;;  %p1379_p4 = scmp.lt.s32.totalorder %s21_s22, %s21_s22 }
   0xa   :  { %p1375_p3 = scmp.ne.s32.totalorder %s21_s22, %s1374_s30  ;;  %p1380_p5 = scmp.lt.s32.totalorder %s1374_s30, %s1374_s30 }
   0xc   :  { %p1381_p6 = por %p1380_p5, %p1379_p4 }
   0xe   :  { %p1382_p7 = pnand %p1381_p6, %p1375_p3 }
  0x10   :  { %1385 = shalt.err (!%p1382_p7)
}
  0x11   :  { %s1507_s7 = smov 64   ;;  %s1508_s8 = smov 4  }
  0x12   :  { %26 = dma.hbm_to_vmem [thread:$0]  %s1816_s0, 512, %s21_s22, [#allocation7], %s1507_s7, %s1507_s7, %s1508_s8  }
  0x13   :  { %1496 = dma.done.wait [#allocation7], 512  }
  0x14   :  { %1497 = vsyncadd [#allocation7], 4294966784  ;;  %s1509_s11 = smov [#allocation2]   ;;  %s1510_s13 = smov [#allocation3]  }
  0x15   :  { %s44_s12 = sshll.u32 %s1509_s11, 4  ;;  %s56_s14 = sshll.u32 %s1510_s13, 4  ;;  %s45_s12 = int_to_ptr.vmem [resolvable:$true] %s44_s12  ;;  %s57_s14 = int_to_ptr.vmem [resolvable:$true] %s56_s14 }
  0x16   :  { %s1386_s17 = scalar_lea.hbm %s1817_s1, 256 }
  0x17   :  { %p1387_p8 = scmp.ne.s32.totalorder %s1817_s1, %s1386_s17  ;;  %p1390_p9 = scmp.lt.u32.totalorder %s1386_s17, %s1817_s1 }
  0x19   :  { %p1392_p10 = pnand %p1390_p9, %p1387_p8 }
  0x1b   :  { %1395 = shalt.err (!%p1392_p10)  }
  0x1c   :  { %s1396_s0 = scalar_lea.vmem %s45_s12, 256  ;;  %p1401_p12 = scmp.lt.s32.totalorder %s45_s12, %s45_s12 }
  0x1d   :  { %p1397_p11 = scmp.ne.s32.totalorder %s45_s12, %s1396_s0  ;;  %p1402_p13 = scmp.lt.s32.totalorder %s1396_s0, %s1396_s0 }
  0x1f   :  { %p1403_p0 = por %p1402_p13, %p1401_p12 }
  0x21   :  { %p1404_p1 = pnand %p1403_p0, %p1397_p11 }
  0x23   :  { %1407 = shalt.err (!%p1404_p1)  }
  0x24   :  { %47 = dma.hbm_to_vmem [thread:$0]  %s1817_s1, 256, %s45_s12, [#allocation5] }
  0x25   :  { %s1408_s26 = scalar_lea.hbm %s1818_s2, 256 }
  0x26   :  { %p1409_p2 = scmp.ne.s32.totalorder %s1818_s2, %s1408_s26  ;;  %p1412_p3 = scmp.lt.u32.totalorder %s1408_s26, %s1818_s2 }
  0x28   :  { %p1414_p4 = pnand %p1412_p3, %p1409_p2 }
  0x2a   :  { %1417 = shalt.err (!%p1414_p4)  }
  0x2b   :  { %s1418_s9 = scalar_lea.vmem %s57_s14, 256  ;;  %p1423_p6 = scmp.lt.s32.totalorder %s57_s14, %s57_s14 }
  0x2c   :  { %p1419_p5 = scmp.ne.s32.totalorder %s57_s14, %s1418_s9  ;;  %p1424_p7 = scmp.lt.s32.totalorder %s1418_s9, %s1418_s9 }
  0x2e   :  { %p1425_p8 = por %p1424_p7, %p1423_p6 }
  0x30   :  { %p1426_p9 = pnand %p1425_p8, %p1419_p5 }
  0x32   :  { %1429 = shalt.err (!%p1426_p9)  }
  0x33   :  { %59 = dma.hbm_to_vmem [thread:$0]  %s1818_s2, 256, %s57_s14, [#allocation5 + $0x1] }
  0x34   :  { %1498 = dma.done.wait [#allocation5], 256 }
  0x35   :  { %1499 = vsyncadd [#allocation5], 4294967040 }
  0x36   :  { %1500 = dma.done.wait [#allocation5 + $0x1], 256 }
  0x37   :  { %1501 = vsyncadd [#allocation5 + $0x1], 4294967040  ;;  %vm66_vm0 = vcmask 261120   ;;  %v1511_v0 = vmov 0.0   ;;  %vm1512_vm1 = vmmov 0   ;;  %v1602_v1 = vld [vmem:[#allocation2] sm:$0xff] }
  0x38   :  { %1120 = vmatprep.subr.bf16.mxu0 %v1511_v0  ;;  %1124 = vmatprep.mubr.msk.bf16.mxu0 %vm1512_vm1, %v1511_v0  ;;  %67 = vst.msk [vmem:[#allocation10] sm:$0xff] %vm66_vm0, %v1511_v0  ;;  %68 = vst.msk [vmem:[#allocation12] sm:$0xff] %vm66_vm0, %v1511_v0  ;;  %v1607_v2 = vld [vmem:[#allocation2 + $0x8] sm:$0xff]  ;;  %v74_v3 = vld [vmem:[#allocation6] sm:$0xf]  ;;  %s1513_s12 = smov 32  }
  0x39   :  { %1128 = vmatprep.subr.bf16.mxu1 %v1511_v0  ;;  %1132 = vmatprep.mubr.msk.bf16.mxu1 %vm1512_vm1, %v1511_v0  ;;  %v174_v4 = vld [vmem:[#allocation6 + $0x8] sm:$0xf]  ;;  %v268_v5 = vld [vmem:[#allocation6 + $0x10] sm:$0xf]  ;;  %v362_v6 = vld [vmem:[#allocation6 + $0x18] sm:$0xf] }
  0x3a   :  { %1121 = vmatpush3.bf16.msra.mxu0 %v1602_v1  ;;  %1129 = vmatpush3.bf16.msra.mxu1 %v1602_v1  ;;  %v1635_v7 = vld [vmem:[#allocation3] sm:$0xff]  ;;  %v1642_v9 = vld [vmem:[#allocation3 + $0x8] sm:$0xff]  ;;  %v127_v11 = vld [vmem:[#allocation6 + $0x4] sm:$0xf]  ;;  %vm522_vm2 = vcmask 257024   ;;  %s1515_s13 = smov [#allocation10]  }
  0x3b   :  { %1122 = vmatprep.subr.bf16.mxu0 %v1511_v0  ;;  %1130 = vmatprep.subr.bf16.mxu1 %v1511_v0  ;;  %v221_v12 = vld [vmem:[#allocation6 + $0xc] sm:$0xf]  ;;  %v1663_v13 = vld [vmem:[%s1819_s3] ss:$0 sm:$0xff]  ;;  %v315_v22 = vld [vmem:[#allocation6 + $0x14] sm:$0xf] }
  0x3c   :  { %v409_v23 = vld [vmem:[#allocation6 + $0x1c] sm:$0xf]  ;;  %s1514_s3 = smov 96   ;;  %s1006_s14 = sshll.u32 %s1515_s13, 4  ;;  %s1007_s14 = int_to_ptr.vmem [resolvable:$true] %s1006_s14 }
  0x3d   :  { %s1516_s15 = smov [#allocation12]   ;;  %s1517_s17 = smov [#allocation9]  }
  0x3e   :  { %1123 = vmatpush3.bf16.msra.mxu0 %v1607_v2  ;;  %1131 = vmatpush3.bf16.msra.mxu1 %v1607_v2  ;;  %s1016_s16 = sshll.u32 %s1516_s15, 4  ;;  %s993_s18 = sshll.u32 %s1517_s17, 4  ;;  %s1761_s16 = int_to_ptr.vmem [resolvable:$true] %s1016_s16  ;;  %s1764_s18 = int_to_ptr.vmem [resolvable:$true] %s993_s18 }
  0x3f   :  { %1136 = vmatprep.subr.bf16.mxu0 %v1511_v0  ;;  %1144 = vmatprep.subr.bf16.mxu1 %v1511_v0  ;;  %v455_v8 = vld [vmem:[#allocation10] sm:$0xff]  ;;  %v456_v27 = vld [vmem:[#allocation12] sm:$0xff]  ;;  %s1430_s19 = scalar_lea.vmem %s1007_s14, 128  ;;  %p1435_p11 = scmp.lt.s32.totalorder %s1007_s14, %s1007_s14 }
  0x40   :  { %v458_v10 = vpack.c.bf16 %v455_v8, %v455_v8  ;;  %p1431_p10 = scmp.ne.s32.totalorder %s1007_s14, %s1430_s19  ;;  %p1436_p12 = scmp.lt.s32.totalorder %s1430_s19, %s1430_s19 }
  0x41   :  { %1125 = vmatmul.mubr.msk.bf16.vlgmr.msra.gmra.mrb[0].mxu0 %vm66_vm0, %v74_v3  ;;  %1133 = vmatmul.mubr.msk.bf16.vlgmr.msra.gmra.mrb[0].mxu1 %vm66_vm0, %v127_v11 }
  0x42   :  { %1137 = vmatpush3.bf16.msra.mxu0 %v1602_v1  ;;  %1140 = vmatprep.mubr.msk.bf16.mxu0 %vm1512_vm1, %v1511_v0  ;;  %p1437_p13 = por %p1436_p12, %p1435_p11 }
  0x43   :  { %1138 = vmatprep.subr.bf16.mxu0 %v1511_v0  ;;  %1145 = vmatpush3.bf16.msra.mxu1 %v1602_v1 }
  0x44   :  { %1148 = vmatprep.mubr.msk.bf16.mxu1 %vm1512_vm1, %v1511_v0  ;;  %1146 = vmatprep.subr.bf16.mxu1 %v1511_v0  ;;  %p1438_p0 = pnand %p1437_p13, %p1431_p10 }
  0x46   :  { %1139 = vmatpush3.bf16.msra.mxu0 %v1607_v2 }
  0x47   :  { %1152 = vmatprep.subr.bf16.mxu0 %v1511_v0  ;;  %1147 = vmatpush3.bf16.msra.mxu1 %v1607_v2 }
  0x48   :  { %1160 = vmatprep.subr.bf16.mxu1 %v1511_v0 }
  0x49   :  { %1141 = vmatmul.mubr.msk.bf16.vlgmr.msra.gmra.mrb[4].mxu0 %vm66_vm0, %v174_v4 }
  0x4a   :  { %1153 = vmatpush3.bf16.msra.mxu0 %v1602_v1  ;;  %1156 = vmatprep.mubr.msk.bf16.mxu0 %vm1512_vm1, %v1511_v0 }
  0x4b   :  { %1154 = vmatprep.subr.bf16.mxu0 %v1511_v0  ;;  %1149 = vmatmul.mubr.msk.bf16.vlgmr.msra.gmra.mrb[4].mxu1 %vm66_vm0, %v221_v12 }
  0x4c   :  { %1161 = vmatpush3.bf16.msra.mxu1 %v1602_v1  ;;  %1164 = vmatprep.mubr.msk.bf16.mxu1 %vm1512_vm1, %v1511_v0 }
  0x4d   :  { %1162 = vmatprep.subr.bf16.mxu1 %v1511_v0 }
  0x4e   :  { %1155 = vmatpush3.bf16.msra.mxu0 %v1607_v2 }
  0x4f   :  { %1168 = vmatprep.subr.bf16.mxu0 %v1511_v0 }
  0x50   :  { %1163 = vmatpush3.bf16.msra.mxu1 %v1607_v2 }
  0x51   :  { %1157 = vmatmul.mubr.msk.bf16.vlgmr.msra.gmra.mrb[8].mxu0 %vm66_vm0, %v268_v5  ;;  %1176 = vmatprep.subr.bf16.mxu1 %v1511_v0 }
  0x52   :  { %1169 = vmatpush3.bf16.msra.mxu0 %v1602_v1  ;;  %1172 = vmatprep.mubr.msk.bf16.mxu0 %vm1512_vm1, %v1511_v0 }
  0x53   :  { %1170 = vmatprep.subr.bf16.mxu0 %v1511_v0  ;;  %1165 = vmatmul.mubr.msk.bf16.vlgmr.msra.gmra.mrb[8].mxu1 %vm66_vm0, %v315_v22 }
  0x54   :  { %1177 = vmatpush3.bf16.msra.mxu1 %v1602_v1  ;;  %1180 = vmatprep.mubr.msk.bf16.mxu1 %vm1512_vm1, %v1511_v0 }
  0x55   :  { %1178 = vmatprep.subr.bf16.mxu1 %v1511_v0 }
  0x56   :  { %1171 = vmatpush3.bf16.msra.mxu0 %v1607_v2 }
  0x57   :  { %1184 = vmatprep.subr.bf16.mxu0 %v1511_v0 }
  0x58   :  { %1179 = vmatpush3.bf16.msra.mxu1 %v1607_v2 }
  0x59   :  { %1173 = vmatmul.mubr.msk.bf16.vlgmr.msra.gmra.mrb[12].mxu0 %vm66_vm0, %v362_v6  ;;  %1192 = vmatprep.subr.bf16.mxu1 %v1511_v0 }
  0x5a   :  { %1185 = vmatpush3.bf16.msra.mxu0 %v1635_v7  ;;  %1188 = vmatprep.mubr.msk.bf16.mxu0 %vm1512_vm1, %v1511_v0 }
  0x5b   :  { %1186 = vmatprep.subr.bf16.mxu0 %v1511_v0  ;;  %1181 = vmatmul.mubr.msk.bf16.vlgmr.msra.gmra.mrb[12].mxu1 %vm66_vm0, %v409_v23 }
  0x5c   :  { %1193 = vmatpush3.bf16.msra.mxu1 %v1635_v7  ;;  %1196 = vmatprep.mubr.msk.bf16.mxu1 %vm1512_vm1, %v1511_v0 }
  0x5d   :  { %1194 = vmatprep.subr.bf16.mxu1 %v1511_v0 }
  0x5e   :  { %1187 = vmatpush3.bf16.msra.mxu0 %v1642_v9 }
  0x5f   :  { %1200 = vmatprep.subr.bf16.mxu0 %v1511_v0 }
  0x60   :  { %1195 = vmatpush3.bf16.msra.mxu1 %v1642_v9 }
  0x61   :  { %1189 = vmatmul.mubr.msk.bf16.vlgmr.msra.gmra.mrb[0].mxu0 %vm66_vm0, %v458_v10  ;;  %1208 = vmatprep.subr.bf16.mxu1 %v1511_v0 }
  0x62   :  { %1201 = vmatpush3.bf16.msra.mxu0 %v1635_v7  ;;  %1204 = vmatprep.mubr.msk.bf16.mxu0 %vm1512_vm1, %v1511_v0 }
  0x63   :  { %1202 = vmatprep.subr.bf16.mxu0 %v1511_v0 }
  0x66   :  { %1203 = vmatpush3.bf16.msra.mxu0 %v1642_v9 }
  0x67   :  { %1216 = vmatprep.subr.bf16.mxu0 %v1511_v0 }
 0x134   :  { %v496_v14 = vpop.f32.mrb[0].mxu0 }
 0x135   :  { %v1248_v15 = vadd.f32 %v1663_v13, %v496_v14  ;;  %v1190_v16 = vpop.f32.mrb[1].mxu0 }
 0x136   :  { %v499_v17 = vpop.f32.mrb[2].mxu0 }
 0x137   :  { %v1055_v18 = vmul.f32 -1.442695, %v1248_v15  ;;  %513 = vrot.lane.b32.xlu0 %v1248_v15, %s1513_s12  ;;  %v1191_v19 = vpop.f32.mrb[3].mxu0 }
 0x139   :  { %1300 = vpow2.f32 %v1055_v18 }
 0x143   :  { %v1301_v20 = vpop.eup %1300 }
 0x144   :  { %v506_v21 = vadd.f32 1.0, %v1301_v20 }
 0x146   :  { %1302 = vrcp.f32 %v506_v21 }
 0x150   :  { %v1303_v24 = vpop.eup %1302 }
 0x151   :  { %511 = vrot.lane.b32.xlu1 %v1303_v24, %s1507_s7  ;;  %509 = vrot.lane.b32.xlu0 %v1303_v24, %s1514_s3 }
 0x1a9   :  { %v514_v25 = vpop.permute.xlu0 %513 }
 0x1aa   :  { %1304 = vtanh.f32 %v514_v25 }
 0x1b4   :  { %v1305_v26 = vpop.eup %1304 }
 0x1b5   :  { %v517_v30 = vmul.f32 %v1305_v26, %v1303_v24 }
 0x1c3   :  { %v510_v28 = vpop.permute.xlu0 %509  ;;  %v512_v33 = vpop.permute.xlu1 %511 }
 0x1c4   :  { %v516_v29 = vmul.f32 %v510_v28, %v456_v27 }
 0x1c6   :  { %v518_v31 = vadd.f32 %v517_v30, %v516_v29 }
 0x1c8   :  { %1306 = vtanh.f32 %v518_v31 }
 0x1d2   :  { %v1307_v32 = vpop.eup %1306 }
 0x1d3   :  { %v520_v34 = vmul.f32 %v1307_v32, %v512_v33 }
 0x1d5   :  { %v521_v35 = vpack.c.bf16 %v520_v34, %v520_v34 }
 0x1d7   :  { %523 = vst.msk [vmem:[#allocation9] sm:$0xf] %vm522_vm2, %v521_v35  ;;  %1197 = vmatmul.mubr.msk.bf16.vlgmr.msra.gmra.mrb[0].mxu1 %vm66_vm0, %v521_v35 }
 0x1d8   :  { %1209 = vmatpush3.bf16.msra.mxu1 %v1635_v7  ;;  %1212 = vmatprep.mubr.msk.bf16.mxu1 %vm1512_vm1, %v1511_v0 }
 0x1d9   :  { %1210 = vmatprep.subr.bf16.mxu1 %v1511_v0 }
 0x1dc   :  { %1211 = vmatpush3.bf16.msra.mxu1 %v1642_v9 }
 0x1dd   :  { %1224 = vmatprep.subr.bf16.mxu1 %v1511_v0 }
 0x2aa   :  { %v562_v36 = vpop.f32.mrb[0].mxu1 }
 0x2ab   :  { %v1249_v37 = vadd.f32 %v1663_v13, %v562_v36  ;;  %v1198_v38 = vpop.f32.mrb[1].mxu1 }
 0x2ac   :  { %v565_v39 = vpop.f32.mrb[2].mxu1 }
 0x2ad   :  { %v1057_v40 = vmul.f32 -1.442695, %v1249_v37  ;;  %579 = vrot.lane.b32.xlu1 %v1249_v37, %s1513_s12  ;;  %v1199_v41 = vpop.f32.mrb[3].mxu1 }
 0x2af   :  { %1308 = vpow2.f32 %v1057_v40 }
 0x2b9   :  { %v1309_v42 = vpop.eup %1308 }
 0x2ba   :  { %v572_v43 = vadd.f32 1.0, %v1309_v42 }
 0x2bc   :  { %1310 = vrcp.f32 %v572_v43 }
 0x2c6   :  { %v1311_v44 = vpop.eup %1310 }
 0x2c7   :  { %577 = vrot.lane.b32.xlu1 %v1311_v44, %s1507_s7  ;;  %575 = vrot.lane.b32.xlu0 %v1311_v44, %s1514_s3 }
 0x31f   :  { %v580_v45 = vpop.permute.xlu1 %579 }
 0x320   :  { %1312 = vtanh.f32 %v580_v45 }
 0x32a   :  { %v1313_v46 = vpop.eup %1312 }
 0x32b   :  { %v583_v49 = vmul.f32 %v1313_v46, %v1311_v44 }
 0x339   :  { %v576_v47 = vpop.permute.xlu0 %575  ;;  %v578_v52 = vpop.permute.xlu1 %577 }
 0x33a   :  { %v582_v48 = vmul.f32 %v576_v47, %v518_v31 }
 0x33c   :  { %v584_v50 = vadd.f32 %v583_v49, %v582_v48 }
 0x33e   :  { %1314 = vtanh.f32 %v584_v50 }
 0x348   :  { %v1315_v51 = vpop.eup %1314 }
 0x349   :  { %v586_v53 = vmul.f32 %v1315_v51, %v578_v52 }
 0x34b   :  { %v587_v54 = vpack.c.bf16 %v586_v53, %v586_v53 }
 0x34d   :  { %589 = vst.msk [vmem:[#allocation9 + $0x4] sm:$0xf] %vm522_vm2, %v587_v54  ;;  %1205 = vmatmul.mubr.msk.bf16.vlgmr.msra.gmra.mrb[4].mxu0 %vm66_vm0, %v587_v54 }
 0x34e   :  { %1217 = vmatpush3.bf16.msra.mxu0 %v1635_v7  ;;  %1220 = vmatprep.mubr.msk.bf16.mxu0 %vm1512_vm1, %v1511_v0 }
 0x34f   :  { %1218 = vmatprep.subr.bf16.mxu0 %v1511_v0 }
 0x352   :  { %1219 = vmatpush3.bf16.msra.mxu0 %v1642_v9 }
 0x353   :  { %1232 = vmatprep.subr.bf16.mxu0 %v1511_v0 }
 0x420   :  { %v628_v55 = vpop.f32.mrb[4].mxu0 }
 0x421   :  { %v1250_v56 = vadd.f32 %v1663_v13, %v628_v55  ;;  %v1206_v57 = vpop.f32.mrb[5].mxu0 }
 0x422   :  { %v631_v58 = vpop.f32.mrb[6].mxu0 }
 0x423   :  { %v1059_v59 = vmul.f32 -1.442695, %v1250_v56  ;;  %645 = vrot.lane.b32.xlu0 %v1250_v56, %s1513_s12  ;;  %v1207_v60 = vpop.f32.mrb[7].mxu0 }
 0x425   :  { %1316 = vpow2.f32 %v1059_v59 }
 0x42f   :  { %v1317_v61 = vpop.eup %1316 }
 0x430   :  { %v638_v62 = vadd.f32 1.0, %v1317_v61 }
 0x432   :  { %1318 = vrcp.f32 %v638_v62 }
 0x43c   :  { %v1319_v63 = vpop.eup %1318 }
 0x43d   :  { %643 = vrot.lane.b32.xlu0 %v1319_v63, %s1507_s7  ;;  %641 = vrot.lane.b32.xlu1 %v1319_v63, %s1514_s3 }
 0x495   :  { %v646_v1 = vpop.permute.xlu0 %645 }
 0x496   :  { %1320 = vtanh.f32 %v646_v1 }
 0x4a0   :  { %v1321_v2 = vpop.eup %1320 }
 0x4a1   :  { %v649_v5 = vmul.f32 %v1321_v2, %v1319_v63 }
 0x4af   :  { %v642_v3 = vpop.permute.xlu1 %641  ;;  %v644_v10 = vpop.permute.xlu0 %643 }
 0x4b0   :  { %v648_v4 = vmul.f32 %v642_v3, %v584_v50 }
 0x4b2   :  { %v650_v6 = vadd.f32 %v649_v5, %v648_v4 }
 0x4b4   :  { %1322 = vtanh.f32 %v650_v6 }
 0x4be   :  { %v1323_v8 = vpop.eup %1322 }
 0x4bf   :  { %v652_v11 = vmul.f32 %v1323_v8, %v644_v10 }
 0x4c1   :  { %v653_v12 = vpack.c.bf16 %v652_v11, %v652_v11 }
 0x4c3   :  { %655 = vst.msk [vmem:[#allocation9 + $0x8] sm:$0xf] %vm522_vm2, %v653_v12  ;;  %1213 = vmatmul.mubr.msk.bf16.vlgmr.msra.gmra.mrb[4].mxu1 %vm66_vm0, %v653_v12 }
 0x4c4   :  { %1225 = vmatpush3.bf16.msra.mxu1 %v1635_v7  ;;  %1228 = vmatprep.mubr.msk.bf16.mxu1 %vm1512_vm1, %v1511_v0 }
 0x4c5   :  { %1226 = vmatprep.subr.bf16.mxu1 %v1511_v0 }
 0x4c8   :  { %1227 = vmatpush3.bf16.msra.mxu1 %v1642_v9 }
 0x4c9   :  { %1240 = vmatprep.subr.bf16.mxu1 %v1511_v0 }
 0x596   :  { %v694_v14 = vpop.f32.mrb[4].mxu1 }
 0x597   :  { %v1251_v15 = vadd.f32 %v1663_v13, %v694_v14  ;;  %v1214_v16 = vpop.f32.mrb[5].mxu1 }
 0x598   :  { %v697_v17 = vpop.f32.mrb[6].mxu1 }
 0x599   :  { %v1061_v18 = vmul.f32 -1.442695, %v1251_v15  ;;  %711 = vrot.lane.b32.xlu1 %v1251_v15, %s1513_s12  ;;  %v1215_v19 = vpop.f32.mrb[7].mxu1 }
 0x59b   :  { %1324 = vpow2.f32 %v1061_v18 }
 0x5a5   :  { %v1325_v20 = vpop.eup %1324 }
 0x5a6   :  { %v704_v21 = vadd.f32 1.0, %v1325_v20 }
 0x5a8   :  { %1326 = vrcp.f32 %v704_v21 }
 0x5b2   :  { %v1327_v22 = vpop.eup %1326 }
 0x5b3   :  { %709 = vrot.lane.b32.xlu1 %v1327_v22, %s1507_s7  ;;  %707 = vrot.lane.b32.xlu0 %v1327_v22, %s1514_s3 }
 0x60b   :  { %v712_v23 = vpop.permute.xlu1 %711 }
 0x60c   :  { %1328 = vtanh.f32 %v712_v23 }
 0x616   :  { %v1329_v24 = vpop.eup %1328 }
 0x617   :  { %v715_v27 = vmul.f32 %v1329_v24, %v1327_v22 }
 0x625   :  { %v708_v25 = vpop.permute.xlu0 %707  ;;  %v710_v30 = vpop.permute.xlu1 %709 }
 0x626   :  { %v714_v26 = vmul.f32 %v708_v25, %v650_v6 }
 0x628   :  { %v716_v28 = vadd.f32 %v715_v27, %v714_v26 }
 0x62a   :  { %1330 = vtanh.f32 %v716_v28 }
 0x634   :  { %v1331_v29 = vpop.eup %1330 }
 0x635   :  { %v718_v31 = vmul.f32 %v1331_v29, %v710_v30 }
 0x637   :  { %v719_v32 = vpack.c.bf16 %v718_v31, %v718_v31 }
 0x639   :  { %721 = vst.msk [vmem:[#allocation9 + $0xc] sm:$0xf] %vm522_vm2, %v719_v32  ;;  %1221 = vmatmul.mubr.msk.bf16.vlgmr.msra.gmra.mrb[8].mxu0 %vm66_vm0, %v719_v32 }
 0x63a   :  { %1233 = vmatpush3.bf16.msra.mxu0 %v1635_v7  ;;  %1236 = vmatprep.mubr.msk.bf16.mxu0 %vm1512_vm1, %v1511_v0 }
 0x63b   :  { %1234 = vmatprep.subr.bf16.mxu0 %v1511_v0 }
 0x63e   :  { %1235 = vmatpush3.bf16.msra.mxu0 %v1642_v9 }
 0x70c   :  { %v760_v33 = vpop.f32.mrb[8].mxu0 }
 0x70d   :  { %v1252_v34 = vadd.f32 %v1663_v13, %v760_v33  ;;  %v1222_v35 = vpop.f32.mrb[9].mxu0 }
 0x70e   :  { %v763_v36 = vpop.f32.mrb[10].mxu0 }
 0x70f   :  { %v1063_v37 = vmul.f32 -1.442695, %v1252_v34  ;;  %777 = vrot.lane.b32.xlu0 %v1252_v34, %s1513_s12  ;;  %v1223_v38 = vpop.f32.mrb[11].mxu0 }
 0x711   :  { %1332 = vpow2.f32 %v1063_v37 }
 0x71b   :  { %v1333_v39 = vpop.eup %1332 }
 0x71c   :  { %v770_v40 = vadd.f32 1.0, %v1333_v39 }
 0x71e   :  { %1334 = vrcp.f32 %v770_v40 }
 0x728   :  { %v1335_v41 = vpop.eup %1334 }
 0x729   :  { %775 = vrot.lane.b32.xlu0 %v1335_v41, %s1507_s7  ;;  %773 = vrot.lane.b32.xlu1 %v1335_v41, %s1514_s3 }
 0x781   :  { %v778_v42 = vpop.permute.xlu0 %777 }
 0x782   :  { %1336 = vtanh.f32 %v778_v42 }
 0x78c   :  { %v1337_v43 = vpop.eup %1336 }
 0x78d   :  { %v781_v46 = vmul.f32 %v1337_v43, %v1335_v41 }
 0x79b   :  { %v774_v44 = vpop.permute.xlu1 %773  ;;  %v776_v49 = vpop.permute.xlu0 %775 }
 0x79c   :  { %v780_v45 = vmul.f32 %v774_v44, %v716_v28 }
 0x79e   :  { %v782_v47 = vadd.f32 %v781_v46, %v780_v45 }
 0x7a0   :  { %1338 = vtanh.f32 %v782_v47 }
 0x7aa   :  { %v1339_v48 = vpop.eup %1338 }
 0x7ab   :  { %v784_v50 = vmul.f32 %v1339_v48, %v776_v49 }
 0x7ad   :  { %v785_v51 = vpack.c.bf16 %v784_v50, %v784_v50 }
 0x7af   :  { %787 = vst.msk [vmem:[#allocation9 + $0x10] sm:$0xf] %vm522_vm2, %v785_v51  ;;  %1229 = vmatmul.mubr.msk.bf16.vlgmr.msra.gmra.mrb[8].mxu1 %vm66_vm0, %v785_v51 }
 0x7b0   :  { %1241 = vmatpush3.bf16.msra.mxu1 %v1635_v7  ;;  %1244 = vmatprep.mubr.msk.bf16.mxu1 %vm1512_vm1, %v1511_v0 }
 0x7b1   :  { %1242 = vmatprep.subr.bf16.mxu1 %v1511_v0 }
 0x7b4   :  { %1243 = vmatpush3.bf16.msra.mxu1 %v1642_v9 }
 0x882   :  { %v826_v52 = vpop.f32.mrb[8].mxu1 }
 0x883   :  { %v1253_v53 = vadd.f32 %v1663_v13, %v826_v52  ;;  %v1230_v54 = vpop.f32.mrb[9].mxu1 }
 0x884   :  { %v829_v55 = vpop.f32.mrb[10].mxu1 }
 0x885   :  { %v1065_v56 = vmul.f32 -1.442695, %v1253_v53  ;;  %843 = vrot.lane.b32.xlu1 %v1253_v53, %s1513_s12  ;;  %v1231_v57 = vpop.f32.mrb[11].mxu1 }
 0x887   :  { %1340 = vpow2.f32 %v1065_v56 }
 0x891   :  { %v1341_v58 = vpop.eup %1340 }
 0x892   :  { %v836_v59 = vadd.f32 1.0, %v1341_v58 }
 0x894   :  { %1342 = vrcp.f32 %v836_v59 }
 0x89e   :  { %v1343_v7 = vpop.eup %1342 }
 0x89f   :  { %841 = vrot.lane.b32.xlu1 %v1343_v7, %s1507_s7  ;;  %839 = vrot.lane.b32.xlu0 %v1343_v7, %s1514_s3 }
 0x8f7   :  { %v844_v0 = vpop.permute.xlu1 %843 }
 0x8f8   :  { %1344 = vtanh.f32 %v844_v0 }
 0x902   :  { %v1345_v9 = vpop.eup %1344 }
 0x903   :  { %v847_v62 = vmul.f32 %v1345_v9, %v1343_v7 }
 0x911   :  { %v840_v60 = vpop.permute.xlu0 %839  ;;  %v842_v2 = vpop.permute.xlu1 %841 }
 0x912   :  { %v846_v61 = vmul.f32 %v840_v60, %v782_v47 }
 0x914   :  { %v848_v63 = vadd.f32 %v847_v62, %v846_v61 }
 0x916   :  { %1346 = vtanh.f32 %v848_v63 }
 0x920   :  { %v1347_v1 = vpop.eup %1346 }
 0x921   :  { %v850_v3 = vmul.f32 %v1347_v1, %v842_v2 }
 0x923   :  { %v851_v4 = vpack.c.bf16 %v850_v3, %v850_v3 }
 0x925   :  { %853 = vst.msk [vmem:[#allocation9 + $0x14] sm:$0xf] %vm522_vm2, %v851_v4  ;;  %1237 = vmatmul.mubr.msk.bf16.vlgmr.msra.gmra.mrb[12].mxu0 %vm66_vm0, %v851_v4 }
 0x9f8   :  { %v892_v5 = vpop.f32.mrb[12].mxu0 }
 0x9f9   :  { %v1254_v6 = vadd.f32 %v1663_v13, %v892_v5  ;;  %v1238_v8 = vpop.f32.mrb[13].mxu0 }
 0x9fa   :  { %v895_v10 = vpop.f32.mrb[14].mxu0 }
 0x9fb   :  { %v1067_v11 = vmul.f32 -1.442695, %v1254_v6  ;;  %909 = vrot.lane.b32.xlu0 %v1254_v6, %s1513_s12  ;;  %v1239_v12 = vpop.f32.mrb[15].mxu0 }
 0x9fd   :  { %1348 = vpow2.f32 %v1067_v11 }
 0xa07   :  { %v1349_v14 = vpop.eup %1348 }
 0xa08   :  { %v902_v15 = vadd.f32 1.0, %v1349_v14 }
 0xa0a   :  { %1350 = vrcp.f32 %v902_v15 }
 0xa14   :  { %v1351_v16 = vpop.eup %1350 }
 0xa15   :  { %907 = vrot.lane.b32.xlu0 %v1351_v16, %s1507_s7  ;;  %905 = vrot.lane.b32.xlu1 %v1351_v16, %s1514_s3 }
 0xa6d   :  { %v910_v17 = vpop.permute.xlu0 %909 }
 0xa6e   :  { %1352 = vtanh.f32 %v910_v17 }
 0xa78   :  { %v1353_v18 = vpop.eup %1352 }
 0xa79   :  { %v913_v21 = vmul.f32 %v1353_v18, %v1351_v16 }
 0xa87   :  { %v906_v19 = vpop.permute.xlu1 %905  ;;  %v908_v24 = vpop.permute.xlu0 %907 }
 0xa88   :  { %v912_v20 = vmul.f32 %v906_v19, %v848_v63 }
 0xa8a   :  { %v914_v22 = vadd.f32 %v913_v21, %v912_v20 }
 0xa8c   :  { %1354 = vtanh.f32 %v914_v22 }
 0xa96   :  { %v1355_v23 = vpop.eup %1354 }
 0xa97   :  { %v916_v25 = vmul.f32 %v1355_v23, %v908_v24 }
 0xa99   :  { %v917_v26 = vpack.c.bf16 %v916_v25, %v916_v25 }
 0xa9b   :  { %919 = vst.msk [vmem:[#allocation9 + $0x18] sm:$0xf] %vm522_vm2, %v917_v26  ;;  %1245 = vmatmul.mubr.msk.bf16.vlgmr.msra.gmra.mrb[12].mxu1 %vm66_vm0, %v917_v26 }
 0xb6e   :  { %v958_v27 = vpop.f32.mrb[12].mxu1 }
 0xb6f   :  { %v1255_v28 = vadd.f32 %v1663_v13, %v958_v27  ;;  %v1246_v29 = vpop.f32.mrb[13].mxu1 }
 0xb70   :  { %v961_v30 = vpop.f32.mrb[14].mxu1 }
 0xb71   :  { %v1069_v31 = vmul.f32 -1.442695, %v1255_v28  ;;  %975 = vrot.lane.b32.xlu1 %v1255_v28, %s1513_s12  ;;  %v1247_v32 = vpop.f32.mrb[15].mxu1 }
 0xb73   :  { %1356 = vpow2.f32 %v1069_v31 }
 0xb7d   :  { %v1357_v33 = vpop.eup %1356 }
 0xb7e   :  { %v968_v34 = vadd.f32 1.0, %v1357_v33 }
 0xb80   :  { %1358 = vrcp.f32 %v968_v34 }
 0xb8a   :  { %v1359_v35 = vpop.eup %1358 }
 0xb8b   :  { %973 = vrot.lane.b32.xlu1 %v1359_v35, %s1507_s7  ;;  %971 = vrot.lane.b32.xlu0 %v1359_v35, %s1514_s3 }
 0xbe3   :  { %v976_v36 = vpop.permute.xlu1 %975 }
 0xbe4   :  { %1360 = vtanh.f32 %v976_v36 }
 0xbee   :  { %v1361_v37 = vpop.eup %1360 }
 0xbef   :  { %v979_v39 = vmul.f32 %v1361_v37, %v1359_v35 }
 0xbfd   :  { %v972_v38 = vpop.permute.xlu0 %971  ;;  %v974_v42 = vpop.permute.xlu1 %973 }
 0xbfe   :  { %v978_v13 = vmul.f32 %v972_v38, %v914_v22 }
 0xc00   :  { %v980_v40 = vadd.f32 %v979_v39, %v978_v13 }
 0xc02   :  { %1362 = vtanh.f32 %v980_v40  ;;  %987 = vst.msk [vmem:[#allocation12] sm:$0xff] %vm66_vm0, %v980_v40 }
 0xc0c   :  { %v1363_v41 = vpop.eup %1362 }
 0xc0d   :  { %v982_v43 = vmul.f32 %v1363_v41, %v974_v42 }
 0xc0f   :  { %v983_v44 = vpack.c.bf16 %v982_v43, %v982_v43  ;;  %986 = vst.msk [vmem:[#allocation10] sm:$0xff] %vm66_vm0, %v982_v43 }
 0xc10   :  { %1441 = shalt.err (!%p1438_p0)
}
 0xc11   :  { %s1442_s0 = scalar_lea.hbm %s1821_s5, 128 }
 0xc12   :  { %p1443_p1 = scmp.ne.s32.totalorder %s1821_s5, %s1442_s0  ;;  %p1446_p2 = scmp.lt.u32.totalorder %s1442_s0, %s1821_s5 }
 0xc14   :  { %p1448_p3 = pnand %p1446_p2, %p1443_p1 }
 0xc16   :  { %1451 = shalt.err (!%p1448_p3)
}
 0xc17   :  { %1009 = dma.vmem_to_hbm [thread:$0]  %s1007_s14, 128, %s1821_s5, [#allocation11]   ;;  %985 = vst.msk [vmem:[#allocation9 + $0x1c] sm:$0xf] %vm522_vm2, %v983_v44 }
 0xc18   :  { %s1452_s28 = scalar_lea.vmem %s1761_s16, 128  ;;  %p1457_p5 = scmp.lt.s32.totalorder %s1761_s16, %s1761_s16 }
 0xc19   :  { %p1453_p4 = scmp.ne.s32.totalorder %s1761_s16, %s1452_s28  ;;  %p1458_p6 = scmp.lt.s32.totalorder %s1452_s28, %s1452_s28 }
 0xc1b   :  { %p1459_p7 = por %p1458_p6, %p1457_p5 }
 0xc1d   :  { %p1460_p8 = pnand %p1459_p7, %p1453_p4 }
 0xc1f   :  { %1463 = shalt.err (!%p1460_p8)
}
 0xc20   :  { %s1464_s9 = scalar_lea.hbm %s1822_s6, 128 }
 0xc21   :  { %p1465_p9 = scmp.ne.s32.totalorder %s1822_s6, %s1464_s9  ;;  %p1468_p10 = scmp.lt.u32.totalorder %s1464_s9, %s1822_s6 }
 0xc23   :  { %p1470_p11 = pnand %p1468_p10, %p1465_p9 }
 0xc25   :  { %1473 = shalt.err (!%p1470_p11)
}
 0xc26   :  { %1019 = dma.vmem_to_hbm [thread:$0]  %s1761_s16, 128, %s1822_s6, [#allocation11]  }
 0xc27   :  { %s1474_s3 = scalar_lea.vmem %s1764_s18, 512  ;;  %p1479_p13 = scmp.lt.s32.totalorder %s1764_s18, %s1764_s18 }
 0xc28   :  { %p1475_p12 = scmp.ne.s32.totalorder %s1764_s18, %s1474_s3  ;;  %p1480_p0 = scmp.lt.s32.totalorder %s1474_s3, %s1474_s3 }
 0xc2a   :  { %p1481_p1 = por %p1480_p0, %p1479_p13 }
 0xc2c   :  { %p1482_p2 = pnand %p1481_p1, %p1475_p12 }
 0xc2e   :  { %1485 = shalt.err (!%p1482_p2)
}
 0xc2f   :  { %s1486_s15 = scalar_lea.hbm %s1820_s4, 512 }
 0xc30   :  { %p1487_p3 = scmp.ne.s32.totalorder %s1820_s4, %s1486_s15  ;;  %p1490_p4 = scmp.lt.u32.totalorder %s1486_s15, %s1820_s4 }
 0xc32   :  { %p1492_p5 = pnand %p1490_p4, %p1487_p3 }
 0xc34   :  { %1495 = shalt.err (!%p1492_p5)
}
 0xc35   :  { %999 = dma.vmem_to_hbm [thread:$0]  %s1764_s18, 512, %s1820_s4, [#allocation8], %s1507_s7, %s1507_s7, %s1508_s8  }
 0xc36   :  { %1502 = dma.done.wait [#allocation8], 512  }
 0xc37   :  { %1503 = vsyncadd [#allocation8], 4294966784 }
 0xc38   :  { %1504 = dma.done.wait [#allocation11], 256  }
 0xc39   :  { %1505 = vsyncadd [#allocation11], 4294967040 }
 0xc3a   :  { %1029 = vsyncpa [#allocation7], 1 }
 0xc3b   :  { %1030 = vsyncpa [#allocation8], 1 }
 0xc3c   :  { %1031 = vsyncpa [#allocation11], 1 }
 0xc3d   :  { %1032 = vsyncmov [#allocation5] }
 0xc40   :  { %s1033_s0 = vpop.sfrf %1032 }
 0xc41   :  { %p1070_p6 = scmp.ne.s32.totalorder %s1033_s0, 0 }
 0xc43   :  { %1037 = shalt.err (%p1070_p6)  }
 0xc44   :  { %1039 = vsyncmov [#allocation5 + $0x1] }
 0xc47   :  { %s1040_s22 = vpop.sfrf %1039 }
 0xc48   :  { %p1071_p7 = scmp.ne.s32.totalorder %s1040_s22, 0 }
 0xc4a   :  { %1044 = shalt.err (%p1071_p7)  }

</bundles_post_ra>
